<compile_context>
chip_gen: v7x
topology: tpu7x:2x2x1
jax: 0.10.0
libtpu: 0.0.40
codegen_flags: <defaults>
</compile_context>

<pallas_src>
import functools
import math

import jax
import jax.numpy as jnp
from jax import lax
from jax.experimental import pallas as pl
from jax.experimental.pallas import tpu as pltpu


def _encoder_kernel(x_ref, wqkv_ref, bqkv_ref, wo_ref, bo_ref,
                    g1_ref, be1_ref, w1_ref, b1_ref, w2_ref, b2_ref,
                    g2_ref, be2_ref,
                    out_ref, state_ref, vflat_ref,
                    *, num_heads, head_dim, seq_len, batch_block,
                    num_layers, eps):
    """One EncoderLayer for one batch block per grid step (grid = (B/TB, L))."""
    layer = pl.program_id(1)
    H, hd, S, TB = num_heads, head_dim, seq_len, batch_block
    D = H * hd
    M = TB * S

    # Layer 0: load the input activation into the resident VMEM state.
    @pl.when(layer == 0)
    def _():
        state_ref[...] = x_ref[...].reshape(M, D).astype(jnp.float32)

    x = state_ref[...]                                           # (M, D) f32

    # ---------------- fused QKV projection (bf16 MXU, f32 accumulate) ------
    # Weight columns: [Q | K | V], each head-major; Wq/bq pre-scaled by
    # 1/sqrt(head_dim) in the wrapper.
    qkv = (jnp.dot(x.astype(jnp.bfloat16), wqkv_ref[...],
                   preferred_element_type=jnp.float32) + bqkv_ref[...])  # (M,3D)

    # ---------------- per-head attention (batched over TB) -----------------
    for h in range(H):                                           # static unroll
        q_h = qkv[:, h * hd:(h + 1) * hd].reshape(TB, S, hd)
        k_h = qkv[:, D + h * hd:D + (h + 1) * hd].reshape(TB, S, hd)
        v_h = qkv[:, 2 * D + h * hd:2 * D + (h + 1) * hd].reshape(TB, S, hd)

        s = jnp.einsum('bqd,bkd->bqk', q_h, k_h,
                       preferred_element_type=jnp.float32)       # (TB, S, S)
        s = s - jnp.max(s, axis=-1, keepdims=True)
        p = jnp.exp(s)
        attn = p * pl.reciprocal(jnp.sum(p, axis=-1, keepdims=True),
                                 approx=True)
        vflat_ref[:, h * S:(h + 1) * S, :] = jnp.einsum(
            'bqk,bkd->bqd', attn, v_h,
            preferred_element_type=jnp.float32)                  # (TB, S, hd)

    # ---------------- the module's quirky reshape + output projection ------
    # Reference does values.reshape(B, S, H*hd) on the (B, H, S, hd) tensor:
    # output token t, head-block j  <-  vflat row f = t*H + j (f is h*S + s).
    # Realized as H strided-sublane reads (stride H) and one lane concat.
    y = jnp.concatenate(
        [vflat_ref[:, pl.ds(j, S, stride=H), :] for j in range(H)],
        axis=-1).reshape(M, D)                                   # (M, D)

    attn_out = (jnp.dot(y.astype(jnp.bfloat16), wo_ref[...],
                        preferred_element_type=jnp.float32) + bo_ref[...])
    # TODO(synk): nn.Dropout layers are identity here (inference-mode forward).

    # ---------------- Add & LayerNorm 1 -------------------------------------
    h1 = attn_out + x
    mu1 = jnp.mean(h1, axis=-1, keepdims=True)
    var1 = jnp.mean((h1 - mu1) ** 2, axis=-1, keepdims=True)
    x1 = g1_ref[...] * ((h1 - mu1) * lax.rsqrt(var1 + eps)) + be1_ref[...]

    # ---------------- FeedForward --------------------------------------------
    f = (jnp.dot(x1.astype(jnp.bfloat16), w1_ref[...],
                 preferred_element_type=jnp.float32) + b1_ref[...])
    f = jnp.maximum(f, 0.0)
    f = (jnp.dot(f.astype(jnp.bfloat16), w2_ref[...],
                 preferred_element_type=jnp.float32) + b2_ref[...])

    # ---------------- Add & LayerNorm 2 --------------------------------------
    h2 = f + x1
    mu2 = jnp.mean(h2, axis=-1, keepdims=True)
    var2 = jnp.mean((h2 - mu2) ** 2, axis=-1, keepdims=True)
    x2 = g2_ref[...] * ((h2 - mu2) * lax.rsqrt(var2 + eps)) + be2_ref[...]

    state_ref[...] = x2

    @pl.when(layer == num_layers - 1)
    def _():
        out_ref[...] = x2.reshape(TB, S, D).astype(out_ref.dtype)


def _pick_batch_block(batch, target=8):
    """Largest divisor of batch <= target keeping >=2 grid blocks (megacore)."""
    best = 1
    for tb in range(1, min(batch, target) + 1):
        if batch % tb == 0 and (batch // tb >= 2 or batch == 1):
            best = tb
    return best


def encoder_forward(x, layer_params, *, num_heads, eps=1e-5, batch_block=None):
    """x: (B, S, D) f32.  layer_params: list of PyTorch-layout per-layer params."""
    B, S, D = x.shape
    H = num_heads
    hd = D // H
    L = len(layer_params)
    HF = layer_params[0][6].shape[0]            # ffn hidden (W1 is (HF, D))
    scale = 1.0 / math.sqrt(hd)
    TB = batch_block if batch_block is not None else _pick_batch_block(B)
    assert B % TB == 0

    wdt = jnp.bfloat16                          # MXU-operand / HBM weight dtype

    def prep(params):
        (w_proj, b_proj, wo, bo, g1, be1, w1, b1, w2, b2, g2, be2) = params
        # PyTorch proj output feature o = h*3*hd + {q,k,v}*hd + d
        wp = w_proj.reshape(H, 3, hd, D)
        bp = b_proj.reshape(H, 3, hd)
        wq_t = wp[:, 0].reshape(D, D).T * scale      # (in, out), cols head-major
        wk_t = wp[:, 1].reshape(D, D).T
        wv_t = wp[:, 2].reshape(D, D).T
        w_qkv = jnp.concatenate([wq_t, wk_t, wv_t], axis=1).astype(wdt)  # (D,3D)
        b_qkv = jnp.concatenate([bp[:, 0].reshape(D) * scale,
                                 bp[:, 1].reshape(D),
                                 bp[:, 2].reshape(D)]).reshape(1, 3 * D)
        return (w_qkv, b_qkv,
                wo.T.astype(wdt), bo.reshape(1, D),
                g1.reshape(1, D), be1.reshape(1, D),
                w1.T.astype(wdt), b1.reshape(1, HF),
                w2.T.astype(wdt), b2.reshape(1, D),
                g2.reshape(1, D), be2.reshape(1, D))

    stacked = [jnp.stack(arrs, axis=0)
               for arrs in zip(*(prep(p) for p in layer_params))]

    def layer_spec(shape):
        nd = len(shape)
        return pl.BlockSpec((None,) + shape, lambda b, l: (l,) + (0,) * nd)

    in_specs = [
        pl.BlockSpec((TB, S, D), lambda b, l: (b, 0, 0)),   # x
        layer_spec((D, 3 * D)), layer_spec((1, 3 * D)),     # wqkv, bqkv
        layer_spec((D, D)), layer_spec((1, D)),             # wo, bo
        layer_spec((1, D)), layer_spec((1, D)),             # gamma1, beta1
        layer_spec((D, HF)), layer_spec((1, HF)),           # w1, b1
        layer_spec((HF, D)), layer_spec((1, D)),            # w2, b2
        layer_spec((1, D)), layer_spec((1, D)),             # gamma2, beta2
    ]

    kernel = functools.partial(
        _encoder_kernel, num_heads=H, head_dim=hd, seq_len=S,
        batch_block=TB, num_layers=L, eps=eps)

    return pl.pallas_call(
        kernel,
        out_shape=jax.ShapeDtypeStruct((B, S, D), x.dtype),
        grid_spec=pltpu.PrefetchScalarGridSpec(
            num_scalar_prefetch=0,
            grid=(B // TB, L),
            in_specs=in_specs,
            out_specs=pl.BlockSpec((TB, S, D), lambda b, l: (b, 0, 0)),
            scratch_shapes=[pltpu.VMEM((TB * S, D), jnp.float32),   # activation
                            pltpu.VMEM((TB, H * S, hd), jnp.float32)],  # vals
        ),
        compiler_params=pltpu.CompilerParams(
            dimension_semantics=("parallel", "arbitrary")),
    )(x, *stacked)


# ----------------------------- pure-JAX reference ---------------------------
def _layer_norm(x, gamma, beta, eps=1e-5):
    mu = jnp.mean(x, axis=-1, keepdims=True)
    var = jnp.mean((x - mu) ** 2, axis=-1, keepdims=True)
    return gamma * ((x - mu) / jnp.sqrt(var + eps)) + beta


def _reference(x, layer_params, *, num_heads, eps=1e-5):
    """Pure-JAX replica of the PyTorch Encoder forward (dropout = identity)."""
    B, S, D = x.shape
    H = num_heads
    hd = D // H
    for (w_proj, b_proj, wo, bo, g1, be1, w1, b1, w2, b2, g2, be2) in layer_params:
        residual = x
        qkv = x @ w_proj.T + b_proj                      # (B, S, 3D)
        qkv = qkv.reshape(B, S, H, 3 * hd).transpose(0, 2, 1, 3)
        q, k, v = qkv[..., :hd], qkv[..., hd:2 * hd], qkv[..., 2 * hd:]
        scaled = jnp.einsum("bhqd,bhkd->bhqk", q, k) / math.sqrt(hd)
        attn = jax.nn.softmax(scaled, axis=-1)
        vals = jnp.einsum("bhqk,bhkd->bhqd", attn, v)    # (B, H, S, hd)
        # NOTE: reproduces the module's reshape (no head/seq permute first).
        vals = vals.reshape(B, S, H * hd)
        x = _layer_norm(vals @ wo.T + bo + residual, g1, be1, eps)
        residual = x
        f = jax.nn.relu(x @ w1.T + b1)
        f = f @ w2.T + b2
        x = _layer_norm(f + residual, g2, be2, eps)
    return x


if __name__ == "__main__":
    B, S, D, H = 2, 8, 32, 4
    FFN_HIDDEN, NUM_LAYERS = 64, 2

    key = jax.random.PRNGKey(0)
    key, kx = jax.random.split(key)
    x = jax.random.normal(kx, (B, S, D), jnp.float32)

    def linear_init(k, out_f, in_f):
        bound = 1.0 / math.sqrt(in_f)
        kw, kb = jax.random.split(k)
        w = jax.random.uniform(kw, (out_f, in_f), jnp.float32, -bound, bound)
        b = jax.random.uniform(kb, (out_f,), jnp.float32, -bound, bound)
        return w, b

    layer_params = []
    for _ in range(NUM_LAYERS):
        key, k1, k2, k3, k4, k5, k6, k7, k8 = jax.random.split(key, 9)
        w_proj, b_proj = linear_init(k1, 3 * D, D)
        wo, bo = linear_init(k2, D, D)
        w1, b1 = linear_init(k3, FFN_HIDDEN, D)
        w2, b2 = linear_init(k4, D, FFN_HIDDEN)
        g1 = 1.0 + 0.05 * jax.random.normal(k5, (D,), jnp.float32)
        be1 = 0.05 * jax.random.normal(k6, (D,), jnp.float32)
        g2 = 1.0 + 0.05 * jax.random.normal(k7, (D,), jnp.float32)
        be2 = 0.05 * jax.random.normal(k8, (D,), jnp.float32)
        layer_params.append((w_proj, b_proj, wo, bo, g1, be1,
                             w1, b1, w2, b2, g2, be2))

    out = encoder_forward(x, layer_params, num_heads=H)
    out = jax.block_until_ready(out)

    ref = _reference(x, layer_params, num_heads=H)
    assert out.shape == (B, S, D)
    # bf16 MXU operands (weights + activation casts) vs. the pure-f32 reference:
    # expected deviation is ~1e-3..1e-2, so compare at 2e-2.
    assert jnp.allclose(out, ref, atol=2e-2, rtol=2e-2), (
        "mismatch vs pure-JAX reference, max abs err "
        f"{float(jnp.max(jnp.abs(out - ref)))}")

    print("KERNEL_OK")
</pallas_src>

<mosaic_0001>
module attributes {stable_mosaic.version = 11 : i64} {
  func.func @_encoder_kernel(%arg0: i32, %arg1: i32, %arg2: memref<1x8x32xf32, #tpu.memory_space<vmem>>, %arg3: memref<1x32x96xbf16, #tpu.memory_space<vmem>>, %arg4: memref<1x1x96xf32, #tpu.memory_space<vmem>>, %arg5: memref<1x32x32xbf16, #tpu.memory_space<vmem>>, %arg6: memref<1x1x32xf32, #tpu.memory_space<vmem>>, %arg7: memref<1x1x32xf32, #tpu.memory_space<vmem>>, %arg8: memref<1x1x32xf32, #tpu.memory_space<vmem>>, %arg9: memref<1x32x64xbf16, #tpu.memory_space<vmem>>, %arg10: memref<1x1x64xf32, #tpu.memory_space<vmem>>, %arg11: memref<1x64x32xbf16, #tpu.memory_space<vmem>>, %arg12: memref<1x1x32xf32, #tpu.memory_space<vmem>>, %arg13: memref<1x1x32xf32, #tpu.memory_space<vmem>>, %arg14: memref<1x1x32xf32, #tpu.memory_space<vmem>>, %arg15: memref<1x8x32xf32, #tpu.memory_space<vmem>>, %arg16: memref<8x32xf32, #tpu.memory_space<vmem>>, %arg17: memref<1x32x8xf32, #tpu.memory_space<vmem>>) attributes {dimension_semantics = [#tpu.dimension_semantics<parallel>, #tpu.dimension_semantics<arbitrary>], iteration_bounds = array<i64: 2, 2>, scalar_prefetch = 0 : i64, scratch_operands = 2 : i64, tpu.core_type = #tpu.core_type<tc>, window_params = [{transform_indices = @transform_0, window_bounds = array<i64: 1, 8, 32>}, {transform_indices = @transform_1, window_bounds = array<i64: 1, 32, 96>}, {transform_indices = @transform_2, window_bounds = array<i64: 1, 1, 96>}, {transform_indices = @transform_3, window_bounds = array<i64: 1, 32, 32>}, {transform_indices = @transform_4, window_bounds = array<i64: 1, 1, 32>}, {transform_indices = @transform_5, window_bounds = array<i64: 1, 1, 32>}, {transform_indices = @transform_6, window_bounds = array<i64: 1, 1, 32>}, {transform_indices = @transform_7, window_bounds = array<i64: 1, 32, 64>}, {transform_indices = @transform_8, window_bounds = array<i64: 1, 1, 64>}, {transform_indices = @transform_9, window_bounds = array<i64: 1, 64, 32>}, {transform_indices = @transform_10, window_bounds = array<i64: 1, 1, 32>}, {transform_indices = @transform_11, window_bounds = array<i64: 1, 1, 32>}, {transform_indices = @transform_12, window_bounds = array<i64: 1, 1, 32>}, {transform_indices = @transform_13, window_bounds = array<i64: 1, 8, 32>}]} {
    %c0_i32 = arith.constant 0 : i32
    %0 = arith.cmpi eq, %arg1, %c0_i32 : i32
    %1 = arith.extui %0 : i1 to i32
    %c0_i32_0 = arith.constant 0 : i32
    %2 = arith.cmpi ne, %1, %c0_i32_0 : i32
    scf.if %2 {
      %c0_89 = arith.constant 0 : index
      %c0_90 = arith.constant 0 : index
      %c0_91 = arith.constant 0 : index
      %178 = vector.load %arg2[%c0_89, %c0_90, %c0_91] : memref<1x8x32xf32, #tpu.memory_space<vmem>>, vector<1x8x32xf32>
      %179 = vector.shape_cast %178 : vector<1x8x32xf32> to vector<8x32xf32>
      %c0_92 = arith.constant 0 : index
      %c0_93 = arith.constant 0 : index
      %180 = vector.load %arg16[%c0_92, %c0_93] : memref<8x32xf32, #tpu.memory_space<vmem>>, vector<8x32xf32>
      tpu.vector_store %arg16[%c0_92, %c0_93], %179 {strides = array<i32>} : memref<8x32xf32, #tpu.memory_space<vmem>>, vector<8x32xf32>,
    } else {
    }
    %c0 = arith.constant 0 : index
    %c0_1 = arith.constant 0 : index
    %3 = vector.load %arg16[%c0, %c0_1] : memref<8x32xf32, #tpu.memory_space<vmem>>, vector<8x32xf32>
    %4 = arith.truncf %3 : vector<8x32xf32> to vector<8x32xbf16>
    %c0_2 = arith.constant 0 : index
    %c0_3 = arith.constant 0 : index
    %c0_4 = arith.constant 0 : index
    %5 = vector.load %arg3[%c0_2, %c0_3, %c0_4] : memref<1x32x96xbf16, #tpu.memory_space<vmem>>, vector<1x32x96xbf16>
    %6 = vector.shape_cast %5 : vector<1x32x96xbf16> to vector<32x96xbf16>
    %cst = arith.constant dense<0.000000e+00> : vector<8x96xf32>
    %7 = tpu.matmul %4, %6, %cst {dimension_numbers = #tpu.dot_dimension_numbers<[1], [0], [0], [1], [0, 0, 1, 1], [], []>} : vector<8x32xbf16>, vector<32x96xbf16>, vector<8x96xf32> -> vector<8x96xf32>
    %c0_5 = arith.constant 0 : index
    %c0_6 = arith.constant 0 : index
    %c0_7 = arith.constant 0 : index
    %8 = vector.load %arg4[%c0_5, %c0_6, %c0_7] : memref<1x1x96xf32, #tpu.memory_space<vmem>>, vector<1x1x96xf32>
    %9 = vector.shape_cast %8 : vector<1x1x96xf32> to vector<1x96xf32>
    %10 = vector.broadcast %9 : vector<1x96xf32> to vector<8x96xf32>
    %11 = arith.addf %7, %10 : vector<8x96xf32>
    %12 = vector.extract_strided_slice %11 {offsets = [0, 0], sizes = [8, 8], strides = [1, 1]} : vector<8x96xf32> to vector<8x8xf32>
    %13 = vector.shape_cast %12 : vector<8x8xf32> to vector<1x8x8xf32>
    %14 = vector.extract_strided_slice %11 {offsets = [0, 32], sizes = [8, 8], strides = [1, 1]} : vector<8x96xf32> to vector<8x8xf32>
    %15 = vector.shape_cast %14 : vector<8x8xf32> to vector<1x8x8xf32>
    %16 = vector.extract_strided_slice %11 {offsets = [0, 64], sizes = [8, 8], strides = [1, 1]} : vector<8x96xf32> to vector<8x8xf32>
    %17 = vector.shape_cast %16 : vector<8x8xf32> to vector<1x8x8xf32>
    "tpu.trace_start"() <{level = 10 : i32, message = "bqd,bkd->bqk"}> : () -> ()
    %cst_8 = arith.constant dense<0.000000e+00> : vector<1x8x8xf32>
    %18 = tpu.matmul %13, %15, %cst_8 {dimension_numbers = #tpu.dot_dimension_numbers<[2], [2], [1], [1], [0, 0, 0, 1, 1, 1], [0], [0]>} : vector<1x8x8xf32>, vector<1x8x8xf32>, vector<1x8x8xf32> -> vector<1x8x8xf32>
    "tpu.trace_stop"() : () -> ()
    %cst_9 = arith.constant dense<0xFF800000> : vector<1x8xf32>
    %19 = vector.multi_reduction <maximumf>, %18, %cst_9 [2] : vector<1x8x8xf32> to vector<1x8xf32>
    %20 = vector.shape_cast %19 : vector<1x8xf32> to vector<1x8x1xf32>
    %21 = vector.broadcast %20 : vector<1x8x1xf32> to vector<1x8x8xf32>
    %22 = arith.subf %18, %21 : vector<1x8x8xf32>
    %23 = math.exp %22 : vector<1x8x8xf32>
    %cst_10 = arith.constant dense<0.000000e+00> : vector<1x8xf32>
    %24 = vector.multi_reduction <add>, %23, %cst_10 [2] : vector<1x8x8xf32> to vector<1x8xf32>
    %25 = vector.shape_cast %24 : vector<1x8xf32> to vector<1x8x1xf32>
    %26 = tpu.reciprocal %25 {approx = true} : vector<1x8x1xf32> -> vector<1x8x1xf32>
    %27 = vector.broadcast %26 : vector<1x8x1xf32> to vector<1x8x8xf32>
    %28 = arith.mulf %23, %27 : vector<1x8x8xf32>
    "tpu.trace_start"() <{level = 10 : i32, message = "bqk,bkd->bqd"}> : () -> ()
    %cst_11 = arith.constant dense<0.000000e+00> : vector<1x8x8xf32>
    %29 = tpu.matmul %28, %17, %cst_11 {dimension_numbers = #tpu.dot_dimension_numbers<[2], [1], [1], [2], [0, 0, 0, 1, 1, 2], [0], [0]>} : vector<1x8x8xf32>, vector<1x8x8xf32>, vector<1x8x8xf32> -> vector<1x8x8xf32>
    "tpu.trace_stop"() : () -> ()
    %c0_12 = arith.constant 0 : index
    %c0_13 = arith.constant 0 : index
    %c0_14 = arith.constant 0 : index
    %30 = vector.load %arg17[%c0_12, %c0_13, %c0_14] : memref<1x32x8xf32, #tpu.memory_space<vmem>>, vector<1x8x8xf32>
    tpu.vector_store %arg17[%c0_12, %c0_13, %c0_14], %29 {strides = array<i32>} : memref<1x32x8xf32, #tpu.memory_space<vmem>>, vector<1x8x8xf32>,
    %31 = vector.extract_strided_slice %11 {offsets = [0, 8], sizes = [8, 8], strides = [1, 1]} : vector<8x96xf32> to vector<8x8xf32>
    %32 = vector.shape_cast %31 : vector<8x8xf32> to vector<1x8x8xf32>
    %33 = vector.extract_strided_slice %11 {offsets = [0, 40], sizes = [8, 8], strides = [1, 1]} : vector<8x96xf32> to vector<8x8xf32>
    %34 = vector.shape_cast %33 : vector<8x8xf32> to vector<1x8x8xf32>
    %35 = vector.extract_strided_slice %11 {offsets = [0, 72], sizes = [8, 8], strides = [1, 1]} : vector<8x96xf32> to vector<8x8xf32>
    %36 = vector.shape_cast %35 : vector<8x8xf32> to vector<1x8x8xf32>
    "tpu.trace_start"() <{level = 10 : i32, message = "bqd,bkd->bqk"}> : () -> ()
    %cst_15 = arith.constant dense<0.000000e+00> : vector<1x8x8xf32>
    %37 = tpu.matmul %32, %34, %cst_15 {dimension_numbers = #tpu.dot_dimension_numbers<[2], [2], [1], [1], [0, 0, 0, 1, 1, 1], [0], [0]>} : vector<1x8x8xf32>, vector<1x8x8xf32>, vector<1x8x8xf32> -> vector<1x8x8xf32>
    "tpu.trace_stop"() : () -> ()
    %cst_16 = arith.constant dense<0xFF800000> : vector<1x8xf32>
    %38 = vector.multi_reduction <maximumf>, %37, %cst_16 [2] : vector<1x8x8xf32> to vector<1x8xf32>
    %39 = vector.shape_cast %38 : vector<1x8xf32> to vector<1x8x1xf32>
    %40 = vector.broadcast %39 : vector<1x8x1xf32> to vector<1x8x8xf32>
    %41 = arith.subf %37, %40 : vector<1x8x8xf32>
    %42 = math.exp %41 : vector<1x8x8xf32>
    %cst_17 = arith.constant dense<0.000000e+00> : vector<1x8xf32>
    %43 = vector.multi_reduction <add>, %42, %cst_17 [2] : vector<1x8x8xf32> to vector<1x8xf32>
    %44 = vector.shape_cast %43 : vector<1x8xf32> to vector<1x8x1xf32>
    %45 = tpu.reciprocal %44 {approx = true} : vector<1x8x1xf32> -> vector<1x8x1xf32>
    %46 = vector.broadcast %45 : vector<1x8x1xf32> to vector<1x8x8xf32>
    %47 = arith.mulf %42, %46 : vector<1x8x8xf32>
    "tpu.trace_start"() <{level = 10 : i32, message = "bqk,bkd->bqd"}> : () -> ()
    %cst_18 = arith.constant dense<0.000000e+00> : vector<1x8x8xf32>
    %48 = tpu.matmul %47, %36, %cst_18 {dimension_numbers = #tpu.dot_dimension_numbers<[2], [1], [1], [2], [0, 0, 0, 1, 1, 2], [0], [0]>} : vector<1x8x8xf32>, vector<1x8x8xf32>, vector<1x8x8xf32> -> vector<1x8x8xf32>
    "tpu.trace_stop"() : () -> ()
    %c0_19 = arith.constant 0 : index
    %c8 = arith.constant 8 : index
    %c0_20 = arith.constant 0 : index
    %49 = vector.load %arg17[%c0_19, %c8, %c0_20] : memref<1x32x8xf32, #tpu.memory_space<vmem>>, vector<1x8x8xf32>
    tpu.vector_store %arg17[%c0_19, %c8, %c0_20], %48 {strides = array<i32>} : memref<1x32x8xf32, #tpu.memory_space<vmem>>, vector<1x8x8xf32>,
    %50 = vector.extract_strided_slice %11 {offsets = [0, 16], sizes = [8, 8], strides = [1, 1]} : vector<8x96xf32> to vector<8x8xf32>
    %51 = vector.shape_cast %50 : vector<8x8xf32> to vector<1x8x8xf32>
    %52 = vector.extract_strided_slice %11 {offsets = [0, 48], sizes = [8, 8], strides = [1, 1]} : vector<8x96xf32> to vector<8x8xf32>
    %53 = vector.shape_cast %52 : vector<8x8xf32> to vector<1x8x8xf32>
    %54 = vector.extract_strided_slice %11 {offsets = [0, 80], sizes = [8, 8], strides = [1, 1]} : vector<8x96xf32> to vector<8x8xf32>
    %55 = vector.shape_cast %54 : vector<8x8xf32> to vector<1x8x8xf32>
    "tpu.trace_start"() <{level = 10 : i32, message = "bqd,bkd->bqk"}> : () -> ()
    %cst_21 = arith.constant dense<0.000000e+00> : vector<1x8x8xf32>
    %56 = tpu.matmul %51, %53, %cst_21 {dimension_numbers = #tpu.dot_dimension_numbers<[2], [2], [1], [1], [0, 0, 0, 1, 1, 1], [0], [0]>} : vector<1x8x8xf32>, vector<1x8x8xf32>, vector<1x8x8xf32> -> vector<1x8x8xf32>
    "tpu.trace_stop"() : () -> ()
    %cst_22 = arith.constant dense<0xFF800000> : vector<1x8xf32>
    %57 = vector.multi_reduction <maximumf>, %56, %cst_22 [2] : vector<1x8x8xf32> to vector<1x8xf32>
    %58 = vector.shape_cast %57 : vector<1x8xf32> to vector<1x8x1xf32>
    %59 = vector.broadcast %58 : vector<1x8x1xf32> to vector<1x8x8xf32>
    %60 = arith.subf %56, %59 : vector<1x8x8xf32>
    %61 = math.exp %60 : vector<1x8x8xf32>
    %cst_23 = arith.constant dense<0.000000e+00> : vector<1x8xf32>
    %62 = vector.multi_reduction <add>, %61, %cst_23 [2] : vector<1x8x8xf32> to vector<1x8xf32>
    %63 = vector.shape_cast %62 : vector<1x8xf32> to vector<1x8x1xf32>
    %64 = tpu.reciprocal %63 {approx = true} : vector<1x8x1xf32> -> vector<1x8x1xf32>
    %65 = vector.broadcast %64 : vector<1x8x1xf32> to vector<1x8x8xf32>
    %66 = arith.mulf %61, %65 : vector<1x8x8xf32>
    "tpu.trace_start"() <{level = 10 : i32, message = "bqk,bkd->bqd"}> : () -> ()
    %cst_24 = arith.constant dense<0.000000e+00> : vector<1x8x8xf32>
    %67 = tpu.matmul %66, %55, %cst_24 {dimension_numbers = #tpu.dot_dimension_numbers<[2], [1], [1], [2], [0, 0, 0, 1, 1, 2], [0], [0]>} : vector<1x8x8xf32>, vector<1x8x8xf32>, vector<1x8x8xf32> -> vector<1x8x8xf32>
    "tpu.trace_stop"() : () -> ()
    %c0_25 = arith.constant 0 : index
    %c16 = arith.constant 16 : index
    %c0_26 = arith.constant 0 : index
    %68 = vector.load %arg17[%c0_25, %c16, %c0_26] : memref<1x32x8xf32, #tpu.memory_space<vmem>>, vector<1x8x8xf32>
    tpu.vector_store %arg17[%c0_25, %c16, %c0_26], %67 {strides = array<i32>} : memref<1x32x8xf32, #tpu.memory_space<vmem>>, vector<1x8x8xf32>,
    %69 = vector.extract_strided_slice %11 {offsets = [0, 24], sizes = [8, 8], strides = [1, 1]} : vector<8x96xf32> to vector<8x8xf32>
    %70 = vector.shape_cast %69 : vector<8x8xf32> to vector<1x8x8xf32>
    %71 = vector.extract_strided_slice %11 {offsets = [0, 56], sizes = [8, 8], strides = [1, 1]} : vector<8x96xf32> to vector<8x8xf32>
    %72 = vector.shape_cast %71 : vector<8x8xf32> to vector<1x8x8xf32>
    %73 = vector.extract_strided_slice %11 {offsets = [0, 88], sizes = [8, 8], strides = [1, 1]} : vector<8x96xf32> to vector<8x8xf32>
    %74 = vector.shape_cast %73 : vector<8x8xf32> to vector<1x8x8xf32>
    "tpu.trace_start"() <{level = 10 : i32, message = "bqd,bkd->bqk"}> : () -> ()
    %cst_27 = arith.constant dense<0.000000e+00> : vector<1x8x8xf32>
    %75 = tpu.matmul %70, %72, %cst_27 {dimension_numbers = #tpu.dot_dimension_numbers<[2], [2], [1], [1], [0, 0, 0, 1, 1, 1], [0], [0]>} : vector<1x8x8xf32>, vector<1x8x8xf32>, vector<1x8x8xf32> -> vector<1x8x8xf32>
    "tpu.trace_stop"() : () -> ()
    %cst_28 = arith.constant dense<0xFF800000> : vector<1x8xf32>
    %76 = vector.multi_reduction <maximumf>, %75, %cst_28 [2] : vector<1x8x8xf32> to vector<1x8xf32>
    %77 = vector.shape_cast %76 : vector<1x8xf32> to vector<1x8x1xf32>
    %78 = vector.broadcast %77 : vector<1x8x1xf32> to vector<1x8x8xf32>
    %79 = arith.subf %75, %78 : vector<1x8x8xf32>
    %80 = math.exp %79 : vector<1x8x8xf32>
    %cst_29 = arith.constant dense<0.000000e+00> : vector<1x8xf32>
    %81 = vector.multi_reduction <add>, %80, %cst_29 [2] : vector<1x8x8xf32> to vector<1x8xf32>
    %82 = vector.shape_cast %81 : vector<1x8xf32> to vector<1x8x1xf32>
    %83 = tpu.reciprocal %82 {approx = true} : vector<1x8x1xf32> -> vector<1x8x1xf32>
    %84 = vector.broadcast %83 : vector<1x8x1xf32> to vector<1x8x8xf32>
    %85 = arith.mulf %80, %84 : vector<1x8x8xf32>
    "tpu.trace_start"() <{level = 10 : i32, message = "bqk,bkd->bqd"}> : () -> ()
    %cst_30 = arith.constant dense<0.000000e+00> : vector<1x8x8xf32>
    %86 = tpu.matmul %85, %74, %cst_30 {dimension_numbers = #tpu.dot_dimension_numbers<[2], [1], [1], [2], [0, 0, 0, 1, 1, 2], [0], [0]>} : vector<1x8x8xf32>, vector<1x8x8xf32>, vector<1x8x8xf32> -> vector<1x8x8xf32>
    "tpu.trace_stop"() : () -> ()
    %c0_31 = arith.constant 0 : index
    %c24 = arith.constant 24 : index
    %c0_32 = arith.constant 0 : index
    %87 = vector.load %arg17[%c0_31, %c24, %c0_32] : memref<1x32x8xf32, #tpu.memory_space<vmem>>, vector<1x8x8xf32>
    tpu.vector_store %arg17[%c0_31, %c24, %c0_32], %86 {strides = array<i32>} : memref<1x32x8xf32, #tpu.memory_space<vmem>>, vector<1x8x8xf32>,
    %c0_33 = arith.constant 0 : index
    %c0_34 = arith.constant 0 : index
    %c0_35 = arith.constant 0 : index
    %88 = tpu.strided_load %arg17[%c0_33, %c0_34, %c0_35] {strides = array<i32: 1, 4, 1>} : memref<1x32x8xf32, #tpu.memory_space<vmem>>, vector<1x8x8xf32>
    %c0_36 = arith.constant 0 : index
    %c1 = arith.constant 1 : index
    %c0_37 = arith.constant 0 : index
    %89 = tpu.strided_load %arg17[%c0_36, %c1, %c0_37] {strides = array<i32: 1, 4, 1>} : memref<1x32x8xf32, #tpu.memory_space<vmem>>, vector<1x8x8xf32>
    %c0_38 = arith.constant 0 : index
    %c2 = arith.constant 2 : index
    %c0_39 = arith.constant 0 : index
    %90 = tpu.strided_load %arg17[%c0_38, %c2, %c0_39] {strides = array<i32: 1, 4, 1>} : memref<1x32x8xf32, #tpu.memory_space<vmem>>, vector<1x8x8xf32>
    %c0_40 = arith.constant 0 : index
    %c3 = arith.constant 3 : index
    %c0_41 = arith.constant 0 : index
    %91 = tpu.strided_load %arg17[%c0_40, %c3, %c0_41] {strides = array<i32: 1, 4, 1>} : memref<1x32x8xf32, #tpu.memory_space<vmem>>, vector<1x8x8xf32>
    %92 = tpu.concatenate %88, %89, %90, %91 in 2 : vector<1x8x8xf32>, vector<1x8x8xf32>, vector<1x8x8xf32>, vector<1x8x8xf32> -> vector<1x8x32xf32>
    %93 = vector.shape_cast %92 : vector<1x8x32xf32> to vector<8x32xf32>
    %94 = arith.truncf %93 : vector<8x32xf32> to vector<8x32xbf16>
    %c0_42 = arith.constant 0 : index
    %c0_43 = arith.constant 0 : index
    %c0_44 = arith.constant 0 : index
    %95 = vector.load %arg5[%c0_42, %c0_43, %c0_44] : memref<1x32x32xbf16, #tpu.memory_space<vmem>>, vector<1x32x32xbf16>
    %96 = vector.shape_cast %95 : vector<1x32x32xbf16> to vector<32x32xbf16>
    %cst_45 = arith.constant dense<0.000000e+00> : vector<8x32xf32>
    %97 = tpu.matmul %94, %96, %cst_45 {dimension_numbers = #tpu.dot_dimension_numbers<[1], [0], [0], [1], [0, 0, 1, 1], [], []>} : vector<8x32xbf16>, vector<32x32xbf16>, vector<8x32xf32> -> vector<8x32xf32>
    %c0_46 = arith.constant 0 : index
    %c0_47 = arith.constant 0 : index
    %c0_48 = arith.constant 0 : index
    %98 = vector.load %arg6[%c0_46, %c0_47, %c0_48] : memref<1x1x32xf32, #tpu.memory_space<vmem>>, vector<1x1x32xf32>
    %99 = vector.shape_cast %98 : vector<1x1x32xf32> to vector<1x32xf32>
    %100 = vector.broadcast %99 : vector<1x32xf32> to vector<8x32xf32>
    %101 = arith.addf %97, %100 : vector<8x32xf32>
    %102 = arith.addf %101, %3 : vector<8x32xf32>
    %cst_49 = arith.constant dense<0.000000e+00> : vector<8xf32>
    %103 = vector.multi_reduction <add>, %102, %cst_49 [1] : vector<8x32xf32> to vector<8xf32>
    %104 = vector.shape_cast %103 : vector<8xf32> to vector<8x1xf32>
    %cst_50 = arith.constant 3.200000e+01 : f32
    %105 = vector.broadcast %cst_50 : f32 to vector<8x1xf32>
    %106 = arith.divf %104, %105 : vector<8x1xf32>
    %107 = vector.broadcast %106 : vector<8x1xf32> to vector<8x32xf32>
    %108 = arith.subf %102, %107 : vector<8x32xf32>
    %109 = arith.mulf %108, %108 : vector<8x32xf32>
    %cst_51 = arith.constant dense<0.000000e+00> : vector<8xf32>
    %110 = vector.multi_reduction <add>, %109, %cst_51 [1] : vector<8x32xf32> to vector<8xf32>
    %111 = vector.shape_cast %110 : vector<8xf32> to vector<8x1xf32>
    %cst_52 = arith.constant 3.200000e+01 : f32
    %112 = vector.broadcast %cst_52 : f32 to vector<8x1xf32>
    %113 = arith.divf %111, %112 : vector<8x1xf32>
    %c0_53 = arith.constant 0 : index
    %c0_54 = arith.constant 0 : index
    %c0_55 = arith.constant 0 : index
    %114 = vector.load %arg7[%c0_53, %c0_54, %c0_55] : memref<1x1x32xf32, #tpu.memory_space<vmem>>, vector<1x1x32xf32>
    %115 = vector.shape_cast %114 : vector<1x1x32xf32> to vector<1x32xf32>
    %116 = vector.broadcast %106 : vector<8x1xf32> to vector<8x32xf32>
    %117 = arith.subf %102, %116 : vector<8x32xf32>
    %cst_56 = arith.constant 9.99999974E-6 : f32
    %118 = vector.broadcast %cst_56 : f32 to vector<8x1xf32>
    %119 = arith.addf %113, %118 : vector<8x1xf32>
    %120 = math.rsqrt %119 : vector<8x1xf32>
    %121 = vector.broadcast %120 : vector<8x1xf32> to vector<8x32xf32>
    %122 = arith.mulf %117, %121 : vector<8x32xf32>
    %123 = vector.broadcast %115 : vector<1x32xf32> to vector<8x32xf32>
    %124 = arith.mulf %123, %122 : vector<8x32xf32>
    %c0_57 = arith.constant 0 : index
    %c0_58 = arith.constant 0 : index
    %c0_59 = arith.constant 0 : index
    %125 = vector.load %arg8[%c0_57, %c0_58, %c0_59] : memref<1x1x32xf32, #tpu.memory_space<vmem>>, vector<1x1x32xf32>
    %126 = vector.shape_cast %125 : vector<1x1x32xf32> to vector<1x32xf32>
    %127 = vector.broadcast %126 : vector<1x32xf32> to vector<8x32xf32>
    %128 = arith.addf %124, %127 : vector<8x32xf32>
    %129 = arith.truncf %128 : vector<8x32xf32> to vector<8x32xbf16>
    %c0_60 = arith.constant 0 : index
    %c0_61 = arith.constant 0 : index
    %c0_62 = arith.constant 0 : index
    %130 = vector.load %arg9[%c0_60, %c0_61, %c0_62] : memref<1x32x64xbf16, #tpu.memory_space<vmem>>, vector<1x32x64xbf16>
    %131 = vector.shape_cast %130 : vector<1x32x64xbf16> to vector<32x64xbf16>
    %cst_63 = arith.constant dense<0.000000e+00> : vector<8x64xf32>
    %132 = tpu.matmul %129, %131, %cst_63 {dimension_numbers = #tpu.dot_dimension_numbers<[1], [0], [0], [1], [0, 0, 1, 1], [], []>} : vector<8x32xbf16>, vector<32x64xbf16>, vector<8x64xf32> -> vector<8x64xf32>
    %c0_64 = arith.constant 0 : index
    %c0_65 = arith.constant 0 : index
    %c0_66 = arith.constant 0 : index
    %133 = vector.load %arg10[%c0_64, %c0_65, %c0_66] : memref<1x1x64xf32, #tpu.memory_space<vmem>>, vector<1x1x64xf32>
    %134 = vector.shape_cast %133 : vector<1x1x64xf32> to vector<1x64xf32>
    %135 = vector.broadcast %134 : vector<1x64xf32> to vector<8x64xf32>
    %136 = arith.addf %132, %135 : vector<8x64xf32>
    %cst_67 = arith.constant 0.000000e+00 : f32
    %137 = vector.broadcast %cst_67 : f32 to vector<8x64xf32>
    %138 = arith.maximumf %136, %137 : vector<8x64xf32>
    %139 = arith.truncf %138 : vector<8x64xf32> to vector<8x64xbf16>
    %c0_68 = arith.constant 0 : index
    %c0_69 = arith.constant 0 : index
    %c0_70 = arith.constant 0 : index
    %140 = vector.load %arg11[%c0_68, %c0_69, %c0_70] : memref<1x64x32xbf16, #tpu.memory_space<vmem>>, vector<1x64x32xbf16>
    %141 = vector.shape_cast %140 : vector<1x64x32xbf16> to vector<64x32xbf16>
    %cst_71 = arith.constant dense<0.000000e+00> : vector<8x32xf32>
    %142 = tpu.matmul %139, %141, %cst_71 {dimension_numbers = #tpu.dot_dimension_numbers<[1], [0], [0], [1], [0, 0, 1, 1], [], []>} : vector<8x64xbf16>, vector<64x32xbf16>, vector<8x32xf32> -> vector<8x32xf32>
    %c0_72 = arith.constant 0 : index
    %c0_73 = arith.constant 0 : index
    %c0_74 = arith.constant 0 : index
    %143 = vector.load %arg12[%c0_72, %c0_73, %c0_74] : memref<1x1x32xf32, #tpu.memory_space<vmem>>, vector<1x1x32xf32>
    %144 = vector.shape_cast %143 : vector<1x1x32xf32> to vector<1x32xf32>
    %145 = vector.broadcast %144 : vector<1x32xf32> to vector<8x32xf32>
    %146 = arith.addf %142, %145 : vector<8x32xf32>
    %147 = arith.addf %146, %128 : vector<8x32xf32>
    %cst_75 = arith.constant dense<0.000000e+00> : vector<8xf32>
    %148 = vector.multi_reduction <add>, %147, %cst_75 [1] : vector<8x32xf32> to vector<8xf32>
    %149 = vector.shape_cast %148 : vector<8xf32> to vector<8x1xf32>
    %cst_76 = arith.constant 3.200000e+01 : f32
    %150 = vector.broadcast %cst_76 : f32 to vector<8x1xf32>
    %151 = arith.divf %149, %150 : vector<8x1xf32>
    %152 = vector.broadcast %151 : vector<8x1xf32> to vector<8x32xf32>
    %153 = arith.subf %147, %152 : vector<8x32xf32>
    %154 = arith.mulf %153, %153 : vector<8x32xf32>
    %cst_77 = arith.constant dense<0.000000e+00> : vector<8xf32>
    %155 = vector.multi_reduction <add>, %154, %cst_77 [1] : vector<8x32xf32> to vector<8xf32>
    %156 = vector.shape_cast %155 : vector<8xf32> to vector<8x1xf32>
    %cst_78 = arith.constant 3.200000e+01 : f32
    %157 = vector.broadcast %cst_78 : f32 to vector<8x1xf32>
    %158 = arith.divf %156, %157 : vector<8x1xf32>
    %c0_79 = arith.constant 0 : index
    %c0_80 = arith.constant 0 : index
    %c0_81 = arith.constant 0 : index
    %159 = vector.load %arg13[%c0_79, %c0_80, %c0_81] : memref<1x1x32xf32, #tpu.memory_space<vmem>>, vector<1x1x32xf32>
    %160 = vector.shape_cast %159 : vector<1x1x32xf32> to vector<1x32xf32>
    %161 = vector.broadcast %151 : vector<8x1xf32> to vector<8x32xf32>
    %162 = arith.subf %147, %161 : vector<8x32xf32>
    %cst_82 = arith.constant 9.99999974E-6 : f32
    %163 = vector.broadcast %cst_82 : f32 to vector<8x1xf32>
    %164 = arith.addf %158, %163 : vector<8x1xf32>
    %165 = math.rsqrt %164 : vector<8x1xf32>
    %166 = vector.broadcast %165 : vector<8x1xf32> to vector<8x32xf32>
    %167 = arith.mulf %162, %166 : vector<8x32xf32>
    %168 = vector.broadcast %160 : vector<1x32xf32> to vector<8x32xf32>
    %169 = arith.mulf %168, %167 : vector<8x32xf32>
    %c0_83 = arith.constant 0 : index
    %c0_84 = arith.constant 0 : index
    %c0_85 = arith.constant 0 : index
    %170 = vector.load %arg14[%c0_83, %c0_84, %c0_85] : memref<1x1x32xf32, #tpu.memory_space<vmem>>, vector<1x1x32xf32>
    %171 = vector.shape_cast %170 : vector<1x1x32xf32> to vector<1x32xf32>
    %172 = vector.broadcast %171 : vector<1x32xf32> to vector<8x32xf32>
    %173 = arith.addf %169, %172 : vector<8x32xf32>
    %c0_86 = arith.constant 0 : index
    %c0_87 = arith.constant 0 : index
    %174 = vector.load %arg16[%c0_86, %c0_87] : memref<8x32xf32, #tpu.memory_space<vmem>>, vector<8x32xf32>
    tpu.vector_store %arg16[%c0_86, %c0_87], %173 {strides = array<i32>} : memref<8x32xf32, #tpu.memory_space<vmem>>, vector<8x32xf32>,
    %c1_i32 = arith.constant 1 : i32
    %175 = arith.cmpi eq, %arg1, %c1_i32 : i32
    %176 = arith.extui %175 : i1 to i32
    %c0_i32_88 = arith.constant 0 : i32
    %177 = arith.cmpi ne, %176, %c0_i32_88 : i32
    scf.if %177 {
      %178 = vector.shape_cast %173 : vector<8x32xf32> to vector<1x8x32xf32>
      %c0_89 = arith.constant 0 : index
      %c0_90 = arith.constant 0 : index
      %c0_91 = arith.constant 0 : index
      %179 = vector.load %arg15[%c0_89, %c0_90, %c0_91] : memref<1x8x32xf32, #tpu.memory_space<vmem>>, vector<1x8x32xf32>
      tpu.vector_store %arg15[%c0_89, %c0_90, %c0_91], %178 {strides = array<i32>} : memref<1x8x32xf32, #tpu.memory_space<vmem>>, vector<1x8x32xf32>,
    } else {
    }
    return
  }
  func.func @transform_0(%arg0: i32, %arg1: i32) -> (i32, i32, i32) {
    %c0_i32 = arith.constant 0 : i32
    %c0_i32_0 = arith.constant 0 : i32
    %c0_i32_1 = arith.constant 0 : i32
    return %arg0, %c0_i32, %c0_i32_0 : i32, i32, i32
  }
  func.func @transform_1(%arg0: i32, %arg1: i32) -> (i32, i32, i32) {
    %c0_i32 = arith.constant 0 : i32
    %c0_i32_0 = arith.constant 0 : i32
    %c0_i32_1 = arith.constant 0 : i32
    return %arg1, %c0_i32, %c0_i32_0 : i32, i32, i32
  }
  func.func @transform_2(%arg0: i32, %arg1: i32) -> (i32, i32, i32) {
    %c0_i32 = arith.constant 0 : i32
    %c0_i32_0 = arith.constant 0 : i32
    %c0_i32_1 = arith.constant 0 : i32
    return %arg1, %c0_i32, %c0_i32_0 : i32, i32, i32
  }
  func.func @transform_3(%arg0: i32, %arg1: i32) -> (i32, i32, i32) {
    %c0_i32 = arith.constant 0 : i32
    %c0_i32_0 = arith.constant 0 : i32
    %c0_i32_1 = arith.constant 0 : i32
    return %arg1, %c0_i32, %c0_i32_0 : i32, i32, i32
  }
  func.func @transform_4(%arg0: i32, %arg1: i32) -> (i32, i32, i32) {
    %c0_i32 = arith.constant 0 : i32
    %c0_i32_0 = arith.constant 0 : i32
    %c0_i32_1 = arith.constant 0 : i32
    return %arg1, %c0_i32, %c0_i32_0 : i32, i32, i32
  }
  func.func @transform_5(%arg0: i32, %arg1: i32) -> (i32, i32, i32) {
    %c0_i32 = arith.constant 0 : i32
    %c0_i32_0 = arith.constant 0 : i32
    %c0_i32_1 = arith.constant 0 : i32
    return %arg1, %c0_i32, %c0_i32_0 : i32, i32, i32
  }
  func.func @transform_6(%arg0: i32, %arg1: i32) -> (i32, i32, i32) {
    %c0_i32 = arith.constant 0 : i32
    %c0_i32_0 = arith.constant 0 : i32
    %c0_i32_1 = arith.constant 0 : i32
    return %arg1, %c0_i32, %c0_i32_0 : i32, i32, i32
  }
  func.func @transform_7(%arg0: i32, %arg1: i32) -> (i32, i32, i32) {
    %c0_i32 = arith.constant 0 : i32
    %c0_i32_0 = arith.constant 0 : i32
    %c0_i32_1 = arith.constant 0 : i32
    return %arg1, %c0_i32, %c0_i32_0 : i32, i32, i32
  }
  func.func @transform_8(%arg0: i32, %arg1: i32) -> (i32, i32, i32) {
    %c0_i32 = arith.constant 0 : i32
    %c0_i32_0 = arith.constant 0 : i32
    %c0_i32_1 = arith.constant 0 : i32
    return %arg1, %c0_i32, %c0_i32_0 : i32, i32, i32
  }
  func.func @transform_9(%arg0: i32, %arg1: i32) -> (i32, i32, i32) {
    %c0_i32 = arith.constant 0 : i32
    %c0_i32_0 = arith.constant 0 : i32
    %c0_i32_1 = arith.constant 0 : i32
    return %arg1, %c0_i32, %c0_i32_0 : i32, i32, i32
  }
  func.func @transform_10(%arg0: i32, %arg1: i32) -> (i32, i32, i32) {
    %c0_i32 = arith.constant 0 : i32
    %c0_i32_0 = arith.constant 0 : i32
    %c0_i32_1 = arith.constant 0 : i32
    return %arg1, %c0_i32, %c0_i32_0 : i32, i32, i32
  }
  func.func @transform_11(%arg0: i32, %arg1: i32) -> (i32, i32, i32) {
    %c0_i32 = arith.constant 0 : i32
    %c0_i32_0 = arith.constant 0 : i32
    %c0_i32_1 = arith.constant 0 : i32
    return %arg1, %c0_i32, %c0_i32_0 : i32, i32, i32
  }
  func.func @transform_12(%arg0: i32, %arg1: i32) -> (i32, i32, i32) {
    %c0_i32 = arith.constant 0 : i32
    %c0_i32_0 = arith.constant 0 : i32
    %c0_i32_1 = arith.constant 0 : i32
    return %arg1, %c0_i32, %c0_i32_0 : i32, i32, i32
  }
  func.func @transform_13(%arg0: i32, %arg1: i32) -> (i32, i32, i32) {
    %c0_i32 = arith.constant 0 : i32
    %c0_i32_0 = arith.constant 0 : i32
    %c0_i32_1 = arith.constant 0 : i32
    return %arg0, %c0_i32, %c0_i32_0 : i32, i32, i32
  }
}

</mosaic_0001>

<bundles_post_ra>
// kernel: tpu_custom_call.1
= control target key start
LH: loop header
LB: loop body
LE: loop exit
PB: predicated region body
PF: predicated region fallthrough
CT: control target
= control target key end

     0   :  { %s3332_s0 = inlined_call_operand.hbm [shape: f32[2,8,32], index: 0, kind: input, shape index: {}]   ;;  %s3333_s1 = inlined_call_operand.vmem [shape: bf16[2,32,96], index: 1, kind: input, shape index: {}]   ;;  %s3334_s2 = inlined_call_operand.vmem [shape: f32[2,1,96], index: 2, kind: input, shape index: {}]   ;;  %s3335_s3 = inlined_call_operand.vmem [shape: bf16[2,32,32], index: 3, kind: input, shape index: {}]   ;;  %s3336_s4 = inlined_call_operand.hbm [shape: f32[2,1,32], index: 4, kind: input, shape index: {}]   ;;  %s3337_s5 = inlined_call_operand.hbm [shape: f32[2,1,32], index: 5, kind: input, shape index: {}]   ;;  %s3338_s6 = inlined_call_operand.hbm [shape: f32[2,1,32], index: 6, kind: input, shape index: {}]   ;;  %s3339_s7 = inlined_call_operand.vmem [shape: bf16[2,32,64], index: 7, kind: input, shape index: {}]   ;;  %s3340_s8 = inlined_call_operand.hbm [shape: f32[2,1,64], index: 8, kind: input, shape index: {}]   ;;  %s3341_s9 = inlined_call_operand.vmem [shape: bf16[2,64,32], index: 9, kind: input, shape index: {}]   ;;  %s3342_s10 = inlined_call_operand.vmem [shape: f32[2,1,32], index: 10, kind: input, shape index: {}]   ;;  %s3343_s11 = inlined_call_operand.vmem [shape: f32[2,1,32], index: 11, kind: input, shape index: {}]   ;;  %s3344_s12 = inlined_call_operand.vmem [shape: f32[2,1,32], index: 12, kind: input, shape index: {}]   ;;  %s3345_s13 = inlined_call_operand.hbm [shape: f32[2,8,32], index: 13, kind: output, shape index: {}]  }
   0x1   :  { %3369 = sst [smem:[#allocation33_spill]] %s3332_s0 }
   0x2   :  { %3370 = sst [smem:[#allocation34_spill]] %s3333_s1 }
   0x3   :  { %3371 = sst [smem:[#allocation35_spill]] %s3334_s2 }
   0x4   :  { %3372 = sst [smem:[#allocation36_spill]] %s3335_s3 }
   0x5   :  { %3373 = sst [smem:[#allocation37_spill]] %s3336_s4 }
   0x6   :  { %3374 = sst [smem:[#allocation38_spill]] %s3337_s5 }
   0x7   :  { %3375 = sst [smem:[#allocation39_spill]] %s3338_s6 }
   0x8   :  { %3376 = sst [smem:[#allocation40_spill]] %s3339_s7 }
   0x9   :  { %3377 = sst [smem:[#allocation41_spill]] %s3340_s8 }
   0xa   :  { %3378 = sst [smem:[#allocation42_spill]] %s3341_s9 }
   0xb   :  { %3379 = sst [smem:[#allocation43_spill]] %s3342_s10 }
   0xc   :  { %3380 = sst [smem:[#allocation44_spill]] %s3343_s11 }
   0xd   :  { %3381 = sst [smem:[#allocation45_spill]] %s3344_s12 }
   0xe   :  { %3382 = sst [smem:[#allocation46_spill]] %s3345_s13 }
   0xf   :  { %18 = vsyncpa [#allocation5], 0 }
  0x10   :  { %20 = vsyncpa [#allocation5 + $0x1], 0 }
  0x11   :  { %21 = vsyncpa [#allocation8], 0 }
  0x12   :  { %23 = vsyncpa [#allocation8 + $0x1], 0 }
  0x13   :  { %24 = vsyncpa [#allocation11], 0 }
  0x14   :  { %26 = vsyncpa [#allocation11 + $0x1], 0 }
  0x15   :  { %27 = vsyncpa [#allocation6], 0 }
  0x16   :  { %29 = vsyncpa [#allocation6 + $0x1], 0  ;;  %s2751_s25 = smov 0   ;;  %s2753_s26 = smov 0  }
  0x17   :  { %s2755_s27 = smov 0   ;;  %s2757_s28 = smov 0  }
  0x18   :  { %s2759_s29 = smov 0   ;;  %s2761_s30 = smov 0  }
  0x19   :  { %s2763_s14 = smov 0   ;;  %s2765_s15 = smov 0  }
  0x1a   :  { %s2767_s16 = smov 0   ;;  %s2769_s17 = smov 0  }
  0x1b   :  { %s2771_s18 = smov 0  }
  0x1c LB: > { %3383 = sst [smem:[#allocation18_spill]] %s2621_s26  ;;  %s44_s19 = sadd.s32 1, %s2649_s16  ;;  %s2657_s18 = sphi %s2771_s18, %s35_s18   ;;  %s2653_s17 = sphi %s2769_s17, %s3460_s17   ;;  %s2649_s16 = sphi %s2767_s16, %s3459_s16   ;;  %s2645_s15 = sphi %s2765_s15, %s3458_s15   ;;  %s2641_s14 = sphi %s2763_s14, %s3457_s14   ;;  %s2637_s30 = sphi %s2761_s30, %s3456_s30   ;;  %s2633_s29 = sphi %s2759_s29, %s3455_s29   ;;  %s2629_s28 = sphi %s2757_s28, %s3454_s28   ;;  %s2625_s27 = sphi %s2755_s27, %s3453_s27   ;;  %s2621_s26 = sphi %s2753_s26, %s3452_s26   ;;  %s2617_s25 = sphi %s2751_s25, %s3451_s25  }
  0x1d   : > { %3384 = sst [smem:[#allocation19_spill]] %s2625_s27  ;;  %p3351_p0 = scmp.eq.s32.totalorder %s2657_s18, 0 }
  0x1e   : > { %3385 = sst [smem:[#allocation20_spill]] %s2629_s28  ;;  %p2808_p1 = scmp.ge.s32.totalorder %s44_s19, 2 }
  0x1f   : > { %3386 = sst [smem:[#allocation21_spill]] %s2633_s29  ;;  %s158_s21 = sadd.s32 1, %s2625_s27 }
  0x20   : > { %3387 = sst [smem:[#allocation22_spill]] %s2637_s30  ;;  %p165_p2 = scmp.ne.s32.totalorder %s2625_s27, %s2621_s26 }
  0x21   : > { %3388 = sst [smem:[#allocation23_spill]] %s2641_s14  ;;  %s3462_s19 = smov (%p2808_p1, %s44_s19), 0 }
  0x22   : > { %3389 = sst [smem:[#allocation24_spill]] %s2645_s15  ;;  %p167_p4 = por %p165_p2, %p3351_p0 }
  0x23   : > { %3390 = sst [smem:[#allocation25_spill]] %s2649_s16  ;;  %s155_s22 = ssub.s32 %s2649_s16, %s3462_s19 }
  0x24   : > { %3391 = sst [smem:[#allocation26_spill]] %s2653_s17  ;;  %p3350_p5 = scmp.lt.s32.totalorder %s2657_s18, 4 }
  0x25   : > { %s3392_s20 = scalar_select %p2808_p1, 1, 0 }
  0x26   : > { %3393 = sst [smem:[#allocation27_spill]] %s3462_s19  ;;  %p156_p6 = scmp.eq.s32.totalorder %s155_s22, 0 }
  0x27   : > { %s3352_s23 = sand.u32 1, %s2657_s18   ;;  %s2828_s24 = sand.u32 1, %s2625_s27  }
  0x28   : > { %s2831_s13 = scalar_select %p156_p6, %s2625_s27, %s158_s21  }
  0x29   : > { %s2834_s15 = sshll.u32 %s2649_s16, 4  ;;  %s3395_s4 = sld [smem:[#allocation37_spill]] }
  0x2a   : > { %3394 = sst [smem:[#allocation28_spill]] %s2831_s13  ;;  %s472_s19 = scalar_lea.vmem [#allocation7], %s2828_s24 }
  0x2b   : > { %s479_s22 = sshll.u32 %s472_s19, 4  ;;  %p2847_p7 = pnand %p3350_p5, %p167_p4  ;;  %s2843_s22 = int_to_ptr.vmem [resolvable:$true] %s479_s22 }
  0x2c   : > { %s2855_s11 = scalar_lea.sflag [#allocation8], %s3352_s23 }
  0x2d   : > { %s3396_s21 = scalar_select %p2847_p7, 1, 0 }
  0x2e   : > { %p2861_p11 = pneg %p2847_p7 }
  0x2f   : > { %s2840_s10 = scalar_lea.hbm %s3395_s4, %s2834_s15  ;;  %s2382_s27 = scalar_lea.hbm %s3395_s4, 32 }
  0x30   : > { %s2377_s12 = scalar_lea.hbm %s2840_s10, 16  ;;  %p2383_p2 = scmp.lt.u32.totalorder %s2840_s10, %s3395_s4 }
  0x31   : > { %p2378_p10 = scmp.ne.s32.totalorder %s2840_s10, %s2377_s12  ;;  %p2384_p4 = scmp.lt.u32.totalorder %s2382_s27, %s2377_s12 }
  0x32   : > { %p2386_p5 = scmp.lt.u32.totalorder %s2377_s12, %s2840_s10 }
  0x33   : > { %p2380_p12 = pnand %p2861_p11, %p2378_p10  ;;  %p2385_p6 = por %p2384_p4, %p2383_p2 }
  0x35   : > { %p2381_p13 = pneg %p2380_p12  ;;  %p2387_p3 = por %p2386_p5, %p2385_p6 }
  0x37   : > { %p2388_p0 = pnand %p2387_p3, %p2381_p13 }
  0x39   : > { %2391 = shalt.err (!%p2388_p0)
}
  0x3a   : > { %s2392_s23 = scalar_lea.vmem %s2843_s22, 16  ;;  %s2659_s13 = smov [#allocation7]  }
  0x3b   : > { %p2393_p10 = scmp.ne.s32.totalorder %s2843_s22, %s2392_s23  ;;  %s2397_s19 = sshll.u32 %s2659_s13, 4  ;;  %s2398_s19 = int_to_ptr.vmem [resolvable:$false] %s2397_s19 }
  0x3c   : > { %s2399_s7 = scalar_lea.vmem %s2398_s19, 32  ;;  %p2400_p9 = scmp.lt.s32.totalorder %s2843_s22, %s2398_s19 }
  0x3d   : > { %p2395_p12 = pnand %p2393_p10, %p2861_p11  ;;  %p2401_p1 = scmp.lt.s32.totalorder %s2399_s7, %s2392_s23 }
  0x3f   : > { %p2396_p8 = pneg %p2395_p12  ;;  %p2402_p2 = por %p2401_p1, %p2400_p9 }
  0x41   : > { %p2403_p4 = pnand %p2402_p2, %p2396_p8 }
  0x43   : > { %2406 = shalt.err (!%p2403_p4)
}
  0x44   : > { %2227 = dma.hbm_to_vmem [thread:$0]  (!%p2847_p7), %s2840_s10, 16, %s2843_s22, %s2855_s11  }
  0x45   : > { %p3398_p0 = scmp.lt.s32.totalorder %s2657_s18, 5  ;;  %p3399_p3 = scmp.ge.s32.totalorder %s2657_s18, 1 }
  0x46   : > { %s3401_s6 = sld [smem:[#allocation39_spill]]  ;;  %s506_s13 = scalar_lea.vmem [#allocation10], %s2828_s24 }
  0x47   : > { %p2889_p5 = pnand %p3399_p3, %p3398_p0  ;;  %s513_s19 = sshll.u32 %s506_s13, 4  ;;  %s514_s19 = int_to_ptr.vmem [resolvable:$true] %s513_s19 }
  0x48   : > { %s3402_s7 = sand.u32 1, %s2657_s18  }
  0x49   : > { %s3400_s9 = scalar_select %p2889_p5, 1, 0 }
  0x4a   : > { %s2902_s10 = scalar_lea.sflag [#allocation11], %s3402_s7 }
  0x4c   : > { %s2897_s12 = scalar_lea.hbm %s3401_s6, %s2834_s15  ;;  %s2412_s27 = scalar_lea.hbm %s3401_s6, 32 }
  0x4d   : > { %s2407_s22 = scalar_lea.hbm %s2897_s12, 16  ;;  %p2413_p13 = scmp.lt.u32.totalorder %s2897_s12, %s3401_s6 }
  0x4e   : > { %p2408_p1 = scmp.ne.s32.totalorder %s2897_s12, %s2407_s22  ;;  %p2414_p6 = scmp.lt.u32.totalorder %s2412_s27, %s2407_s22 }
  0x4f   : > { %p2416_p12 = scmp.lt.u32.totalorder %s2407_s22, %s2897_s12 }
  0x50   : > { %p2410_p8 = pnand %p2408_p1, %p2861_p11  ;;  %p2415_p10 = por %p2414_p6, %p2413_p13 }
  0x52   : > { %p2411_p9 = pneg %p2410_p8  ;;  %p2417_p2 = por %p2416_p12, %p2415_p10 }
  0x54   : > { %p2418_p4 = pnand %p2417_p2, %p2411_p9 }
  0x56   : > { %2421 = shalt.err (!%p2418_p4)
}
  0x57   : > { %s2422_s13 = scalar_lea.vmem %s514_s19, 16  ;;  %s2660_s7 = smov [#allocation10]  }
  0x58   : > { %p2423_p0 = scmp.ne.s32.totalorder %s514_s19, %s2422_s13  ;;  %s2427_s2 = sshll.u32 %s2660_s7, 4  ;;  %s2428_s2 = int_to_ptr.vmem [resolvable:$false] %s2427_s2 }
  0x59   : > { %s2429_s3 = scalar_lea.vmem %s2428_s2, 32  ;;  %p2430_p8 = scmp.lt.s32.totalorder %s514_s19, %s2428_s2 }
  0x5a   : > { %p2425_p3 = pnand %p2423_p0, %p2861_p11  ;;  %p2431_p5 = scmp.lt.s32.totalorder %s2429_s3, %s2422_s13 }
  0x5c   : > { %p2426_p1 = pneg %p2425_p3  ;;  %p2432_p7 = por %p2431_p5, %p2430_p8 }
  0x5e   : > { %p2433_p6 = pnand %p2432_p7, %p2426_p1 }
  0x60   : > { %2436 = shalt.err (!%p2433_p6)
}
  0x61   : > { %p3403_p13 = scmp.ne.s32.totalorder %s3396_s21, 0  ;;  %s2923_s1 = sadd.s32 4294967295, %s2657_s18  }
  0x62   : > { %s2039_s2 = sadd.s32 4294967294, %s2657_s18   ;;  %s47_s4 = sadd.s32 1, %s2653_s17 }
  0x63   : > { %2233 = dma.hbm_to_vmem [thread:$0]  (!%p3403_p13), %s2897_s12, 16, %s514_s19, %s2902_s10  }
  0x64   : > { %p3404_p7 = scmp.ne.s32.totalorder %s3392_s20, 0  ;;  %s54_s22 = sadd.s32 1, %s2637_s30 }
  0x65   : > { %p61_p5 = scmp.ne.s32.totalorder %s2637_s30, %s2633_s29  ;;  %p67_p10 = scmp.ne.s32.totalorder %s2633_s29, %s2629_s28 }
  0x66   : > { %s3464_s4 = smov (!%p3404_p7, %s47_s4), %s2653_s17  ;;  %p3405_p12 = scmp.eq.s32.totalorder %s2657_s18, 0 }
  0x67   : > { %p49_p9 = scmp.ge.s32.totalorder %s3464_s4, 2  ;;  %p68_p4 = scmp.eq.s32.totalorder %s2923_s1, 0 }
  0x68   : > { %p2937_p2 = por %p3405_p12, %p61_p5  ;;  %p3409_p3 = scmp.ne.s32.totalorder %s2621_s26, %s2617_s25 }
  0x69   : > { %s3466_s4 = smov (%p49_p9, %s3464_s4), 0  ;;  %p2947_p0 = por %p68_p4, %p67_p10 }
  0x6a   : > { %3407 = sst [smem:[#allocation29_spill]] %s3466_s4  ;;  %p2954_p1 = por %p3409_p3, %p68_p4 }
  0x6b   : > { %s3408_s20 = scalar_select %p2947_p0, 1, 0 }
  0x6c   : > { %s3410_s19 = scalar_select %p2954_p1, 1, 0 }
  0x6d   : > { %s51_s27 = ssub.s32 %s2653_s17, %s3466_s4  ;;  %p403_p8 = scmp.eq.s32.totalorder %s2923_s1, 3 }
  0x6e   : > { %3411 = sst [smem:[#allocation30_spill]] %s3410_s19  ;;  %p52_p6 = scmp.eq.s32.totalorder %s51_s27, 0 }
  0x6f   : > { %p409_p7 = scmp.eq.s32.totalorder %s2039_s2, 3  ;;  %p2961_p9 = por %p403_p8, %p61_p5 }
  0x70   : > { %s429_s13 = sand.u32 1, %s2637_s30   ;;  %s2043_s6 = sshll.u32 %s2653_s17, 7 }
  0x71   : > { %s3412_s23 = scalar_select %p2961_p9, 1, 0 }
  0x72   : > { %s2967_s7 = scalar_select %p52_p6, %s2637_s30, %s54_s22  }
  0x73   : > { %p2972_p12 = por %p409_p7, %p67_p10  ;;  %s2042_s25 = sshll.u32 %s429_s13, 3 }
  0x74   : > { %3413 = sst [smem:[#allocation31_spill]] %s2967_s7  ;;  %s3416_s0 = sld [smem:[#allocation33_spill]] }
  0x75   : > { %s3414_s3 = scalar_select %p2972_p12, 1, 0 }
  0x76   : > { %s433_s2 = scalar_lea.vmem [#allocation4], %s2042_s25  ;;  %p3417_p5 = scmp.lt.s32.totalorder %s2657_s18, 4 }
  0x77   : > { %3415 = sst [smem:[#allocation32_spill]] %s3414_s3  ;;  %s440_s27 = sshll.u32 %s433_s2, 4  ;;  %s2990_s27 = int_to_ptr.vmem [resolvable:$true] %s440_s27 }
  0x78   : > { %p2986_p4 = pnand %p3417_p5, %p2937_p2  ;;  %s3419_s5 = sld [smem:[#allocation38_spill]] }
  0x79   : > { %s430_s19 = scalar_lea.sflag [#allocation5], %s429_s13 }
  0x7a   : > { %s2980_s4 = scalar_lea.hbm %s3416_s0, %s2043_s6  ;;  %p2439_p3 = pneg %p2986_p4 }
  0x7b   : > { %s2437_s7 = scalar_lea.hbm %s2980_s4, 128  ;;  %s2442_s2 = scalar_lea.hbm %s3416_s0, 256 }
  0x7c   : > { %p2438_p10 = scmp.ne.s32.totalorder %s2980_s4, %s2437_s7  ;;  %p2443_p6 = scmp.lt.u32.totalorder %s2980_s4, %s3416_s0 }
  0x7d   : > { %p2444_p7 = scmp.lt.u32.totalorder %s2442_s2, %s2437_s7  ;;  %p2446_p12 = scmp.lt.u32.totalorder %s2437_s7, %s2980_s4 }
  0x7e   : > { %s2996_s6 = scalar_lea.hbm %s3419_s5, %s2834_s15  ;;  %p2440_p2 = pnand %p2439_p3, %p2438_p10 }
  0x7f   : > { %p2445_p5 = por %p2444_p7, %p2443_p6 }
  0x80   : > { %p2441_p8 = pneg %p2440_p2 }
  0x81   : > { %p2447_p9 = por %p2446_p12, %p2445_p5 }
  0x83   : > { %p2448_p1 = pnand %p2447_p9, %p2441_p8 }
  0x85   : > { %2451 = shalt.err (!%p2448_p1)
}
  0x86   : > { %s2452_s17 = scalar_lea.vmem %s2990_s27, 128  ;;  %s2661_s13 = smov [#allocation4]  }
  0x87   : > { %p2453_p10 = scmp.ne.s32.totalorder %s2990_s27, %s2452_s17  ;;  %s2457_s14 = sshll.u32 %s2661_s13, 4  ;;  %s2458_s14 = int_to_ptr.vmem [resolvable:$false] %s2457_s14 }
  0x88   : > { %s2459_s30 = scalar_lea.vmem %s2458_s14, 256  ;;  %p2460_p13 = scmp.lt.s32.totalorder %s2990_s27, %s2458_s14 }
  0x89   : > { %p2455_p2 = pnand %p2453_p10, %p2439_p3  ;;  %p2461_p6 = scmp.lt.s32.totalorder %s2459_s30, %s2452_s17 }
  0x8b   : > { %p2456_p0 = pneg %p2455_p2  ;;  %p2462_p7 = por %p2461_p6, %p2460_p13 }
  0x8d   : > { %p2463_p12 = pnand %p2462_p7, %p2456_p0 }
  0x8f   : > { %2466 = shalt.err (!%p2463_p12)
}
  0x90   : > { %2224 = dma.hbm_to_vmem [thread:$0]  (!%p2986_p4), %s2980_s4, 128, %s2990_s27, %s430_s19  }
  0x91   : > { %s489_s7 = scalar_lea.vmem [#allocation9], %s2828_s24  ;;  %s3420_s8 = sld [smem:[#allocation41_spill]] }
  0x92   : > { %s496_s3 = sshll.u32 %s489_s7, 4  ;;  %s2467_s17 = scalar_lea.hbm %s2996_s6, 16  ;;  %s497_s3 = int_to_ptr.vmem [resolvable:$true] %s496_s3 }
  0x93   : > { %p2468_p13 = scmp.ne.s32.totalorder %s2996_s6, %s2467_s17  ;;  %s2472_s14 = scalar_lea.hbm %s3419_s5, 32 }
  0x94   : > { %p2473_p9 = scmp.lt.u32.totalorder %s2996_s6, %s3419_s5  ;;  %p2474_p4 = scmp.lt.u32.totalorder %s2472_s14, %s2467_s17 }
  0x95   : > { %p2470_p0 = pnand %p2468_p13, %p2861_p11  ;;  %p2476_p8 = scmp.lt.u32.totalorder %s2467_s17, %s2996_s6 }
  0x96   : > { %p2475_p3 = por %p2474_p4, %p2473_p9 }
  0x97   : > { %s3028_s2 = scalar_lea.hbm %s3420_s8, %s2834_s15  ;;  %p2471_p1 = pneg %p2470_p0 }
  0x98   : > { %p2477_p5 = por %p2476_p8, %p2475_p3 }
  0x9a   : > { %p2478_p10 = pnand %p2477_p5, %p2471_p1 }
  0x9c   : > { %2481 = shalt.err (!%p2478_p10)
}
  0x9d   : > { %s2482_s15 = scalar_lea.vmem %s497_s3, 16  ;;  %s2662_s4 = smov [#allocation9]  }
  0x9e   : > { %p2483_p2 = scmp.ne.s32.totalorder %s497_s3, %s2482_s15  ;;  %s2487_s27 = sshll.u32 %s2662_s4, 4  ;;  %s2488_s27 = int_to_ptr.vmem [resolvable:$false] %s2487_s27 }
  0x9f   : > { %s2489_s19 = scalar_lea.vmem %s2488_s27, 32  ;;  %p2490_p12 = scmp.lt.s32.totalorder %s497_s3, %s2488_s27 }
  0xa0   : > { %p2485_p6 = pnand %p2483_p2, %p2861_p11  ;;  %p2491_p13 = scmp.lt.s32.totalorder %s2489_s19, %s2482_s15 }
  0xa2   : > { %p2486_p7 = pneg %p2485_p6  ;;  %p2492_p0 = por %p2491_p13, %p2490_p12 }
  0xa4   : > { %p2493_p4 = pnand %p2492_p0, %p2486_p7 }
  0xa6   : > { %2496 = shalt.err (!%p2493_p4)
}
  0xa7   : > { %p3421_p9 = scmp.ne.s32.totalorder %s3396_s21, 0  ;;  %s531_s0 = scalar_lea.vmem [#allocation12], %s2828_s24 }
  0xa8   : > { %s538_s7 = sshll.u32 %s531_s0, 4  ;;  %s2497_s12 = scalar_lea.hbm %s3028_s2, 16  ;;  %s539_s7 = int_to_ptr.vmem [resolvable:$true] %s538_s7 }
  0xa9   : > { %2230 = dma.hbm_to_vmem [thread:$0]  (!%p3421_p9), %s2996_s6, 16, %s497_s3, %s2855_s11  }
  0xaa   : > { %p2498_p1 = scmp.ne.s32.totalorder %s3028_s2, %s2497_s12  ;;  %s2502_s22 = scalar_lea.hbm %s3420_s8, 32 }
  0xab   : > { %p2503_p5 = scmp.lt.u32.totalorder %s3028_s2, %s3420_s8  ;;  %p2504_p10 = scmp.lt.u32.totalorder %s2502_s22, %s2497_s12 }
  0xac   : > { %p2500_p3 = pnand %p2498_p1, %p2861_p11  ;;  %p2506_p6 = scmp.lt.u32.totalorder %s2497_s12, %s3028_s2 }
  0xad   : > { %p2505_p2 = por %p2504_p10, %p2503_p5 }
  0xae   : > { %p2501_p8 = pneg %p2500_p3 }
  0xaf   : > { %p2507_p7 = por %p2506_p6, %p2505_p2 }
  0xb1   : > { %p2508_p12 = pnand %p2507_p7, %p2501_p8 }
  0xb3   : > { %2511 = shalt.err (!%p2508_p12)
}
  0xb4   : > { %s2512_s24 = scalar_lea.vmem %s539_s7, 16  ;;  %s2663_s11 = smov [#allocation12]  }
  0xb5   : > { %p2513_p13 = scmp.ne.s32.totalorder %s539_s7, %s2512_s24  ;;  %s2517_s6 = sshll.u32 %s2663_s11, 4  ;;  %s2518_s6 = int_to_ptr.vmem [resolvable:$false] %s2517_s6 }
  0xb6   : > { %s2519_s3 = scalar_lea.vmem %s2518_s6, 32  ;;  %p2520_p1 = scmp.lt.s32.totalorder %s539_s7, %s2518_s6 }
  0xb7   : > { %p2515_p0 = pnand %p2513_p13, %p2861_p11  ;;  %p2521_p3 = scmp.lt.s32.totalorder %s2519_s3, %s2512_s24 }
  0xb9   : > { %p2516_p4 = pneg %p2515_p0  ;;  %p2522_p9 = por %p2521_p3, %p2520_p1 }
  0xbb   : > { %p2523_p5 = pnand %p2522_p9, %p2516_p4 }
  0xbd   : > { %2526 = shalt.err (!%p2523_p5)
}
  0xbe   : > { %p3422_p10 = scmp.ne.s32.totalorder %s3396_s21, 0  ;;  %p3423_p8 = scmp.ne.s32.totalorder %s3400_s9, 0 }
  0xbf   : > { %s3070_s16 = sand.u32 (!%p3423_p8), 1, %s2633_s29   ;;  %p3424_p11 = scmp.ne.s32.totalorder (!%p3423_p8), %s3408_s20, 0 }
  0xc0   : > { %2236 = dma.hbm_to_vmem [thread:$0]  (!%p3422_p10), %s3028_s2, 16, %s539_s7, %s2902_s10  }
  0xc1   : > { %573 = sbr.rel (%p3423_p8) target bundleno = 3281 (0xcd1), region = 72  ;;  %s2049_s30 = sshll.u32 (!%p3423_p8), %s3070_s16, 3 }
  0xc2   : > { %s576_s15 = scalar_lea.sflag (!%p3423_p8), [#allocation5], %s3070_s16  ;;  %s579_s4 = scalar_lea.vmem (!%p3423_p8), [#allocation4], %s2049_s30 }
  0xc8   : > { %2600 = dma.done.wait (%p3424_p11), %s576_s15, 128  }
  0xc9   : > { %2602 = vsyncadd (%p3424_p11), %s576_s15, 4294967168  ;;  %s3425_s21 = sld [smem:[#allocation30_spill]]  ;;  %s584_s10 = sand.u32 1, %s2923_s1  }
  0xca   : > { %s3080_s9 = sand.u32 1, %s2621_s26   ;;  %s585_s2 = scalar_lea.sflag [#allocation8], %s584_s10 }
  0xcf   : > { %p3426_p9 = scmp.ne.s32.totalorder %s3425_s21, 0 }
  0xd1   : > { %2604 = dma.done.wait (%p3426_p9), %s585_s2, 32  }
  0xd2   : > { %2606 = vsyncadd (%p3426_p9), %s585_s2, 4294967264  ;;  %s601_s20 = scalar_lea.sflag [#allocation11], %s584_s10 }
  0xd3   : > { %2608 = dma.done.wait (%p3426_p9), %s601_s20, 32  }
  0xd4   : > { %2610 = vsyncadd (%p3426_p9), %s601_s20, 4294967264  ;;  %s3427_s1 = sld [smem:[#allocation23_spill]]  ;;  %s3430_s21 = sld [smem:[#allocation36_spill]] }
  0xd5   : > { %s3429_s11 = sld [smem:[#allocation34_spill]]  ;;  %s3431_s0 = sld [smem:[#allocation40_spill]] }
  0xd6   : > { %s3432_s29 = sld [smem:[#allocation42_spill]]  ;;  %s3433_s14 = sld [smem:[#allocation43_spill]] }
  0xd7   : > { %s3434_s3 = sld [smem:[#allocation44_spill]]  ;;  %s3435_s28 = sld [smem:[#allocation45_spill]] }
  0xda   : > { %p702_p2 = scmp.lt.s32.totalorder %s3427_s1, 1  ;;  %p2059_p6 = scmp.ne.s32.totalorder %s3427_s1, 0 }
  0xdb   : > { %v739_v0 = vld [vmem:[%s579_s4] sm:$0xff] (!%p2059_p6)  ;;  %vm740_vm0 = vcmask (!%p2059_p6), 261120  }
  0xdc   : > { %s3095_s7 = scalar_select %p702_p2, %s3427_s1, 1 }
  0xdd   : > { %738 = sbr.rel (%p2059_p6) target bundleno = 228 (0xe4), region = 96  ;;  %741 = vst.msk [vmem:[#allocation2] sm:$0xff] (!%p2059_p6), %vm740_vm0, %v739_v0 }
  0xde   : > { %s2099_s12 = sshll.u32 %s3095_s7, 4  ;;  %s2102_s27 = sshll.u32 %s3095_s7, 5 }
  0xdf   : > { %s706_s6 = scalar_lea.vmem %s3429_s11, %s2099_s12  ;;  %s3108_s10 = scalar_lea.vmem %s3430_s21, %s2099_s12 }
  0xe0   : > { %s3113_s19 = scalar_lea.vmem %s3431_s0, %s2099_s12  ;;  %s3119_s25 = scalar_lea.vmem %s3432_s29, %s2102_s27 }
  0xe1   : > { %s727_s24 = scalar_lea.vmem %s3433_s14, %s3095_s7  ;;  %s730_s15 = scalar_lea.vmem %s3434_s3, %s3095_s7 }
  0xe2   : > { %s733_s2 = scalar_lea.vmem %s3435_s28, %s3095_s7  ;;  %s611_s0 = scalar_lea.vmem [#allocation12], %s3080_s9 }
  0xe3   : > { %s3134_s12 = scalar_lea.vmem [#allocation13], %s2049_s30 }
  0xe4 PF: > { %v2347_v1 = vld [vmem:[%s706_s6] sm:$0xff]   ;;  %v2664_v2 = vmov 0.0   ;;  %v2348_v3 = vld [vmem:[%s706_s6 + $0x8] sm:$0xff]   ;;  %vm2665_vm1 = vmmov 0   ;;  %vm767_vm2 = vcmask 261120   ;;  %s3436_s26 = sld [smem:[#allocation35_spill]] }
  0xe5   : > { %2133 = vmatprep.subr.bf16.mxu0 %v2664_v2  ;;  %2146 = vmatprep.subr.mxu1 %v2664_v2  ;;  %v3141_v4 = vld [vmem:[#allocation2] sm:$0xff]  ;;  %s2666_s29 = smov 64   ;;  %s2667_s30 = smov 96   ;;  %vm814_vm3 = vcmask 64512   ;;  %vm1495_vm4 = vcmask 130048   ;;  %vm1497_vm5 = vcmask 195584  }
  0xe6   : > { %2134 = vmatpush3.bf16.msra.mxu0 %v2347_v1  ;;  %2137 = vmatprep.mubr.msk.bf16.mxu0 %vm2665_vm1, %v2664_v2  ;;  %v743_v5 = vpack.c.bf16 %v3141_v4, %v3141_v4  ;;  %s2668_s4 = smov 88   ;;  %s2669_s27 = smov 120   ;;  %vm1705_vm6 = vcmask 523264  }
  0xe7   : > { %2135 = vmatprep.subr.bf16.mxu0 %v2664_v2  ;;  %2148 = vmatprep.mubr.msk.f32.mxu1 %vm2665_vm1, %v2664_v2  ;;  %s2670_s1 = smov 80   ;;  %s2671_s13 = smov 72  }
  0xe8   : > { %s2672_s6 = smov 112   ;;  %s2673_s20 = smov 104  }
  0xe9   : > { %s2674_s17 = smov 56   ;;  %s2675_s22 = smov 40  }
  0xea   : > { %2136 = vmatpush3.bf16.msra.mxu0 %v2348_v3  ;;  %s3437_s28 = scalar_lea.vmem %s3436_s26, %s3095_s7  ;;  %s2676_s14 = smov 48  }
  0xeb   : > { %2141 = vmatprep.subr.mxu0 %v2664_v2  ;;  %v2060_v6 = vld [vmem:[%s3437_s28] ss:$0 sm:$0xff]  ;;  %s2677_s11 = smov 16   ;;  %s2678_s3 = smov 8  }
  0xec   : > { %s2679_s21 = smov 24   ;;  %s3440_s5 = scalar_lea.vmem [#allocation10], %s3080_s9 }
  0xed   : > { %2138 = vmatmul.mubr.msk.bf16.vlgmr.msra.gmra.mrb[0].mxu0 %vm767_vm2, %v743_v5 }
  0xee   : > { %2143 = vmatprep.mubr.msk.f32.mxu0 %vm2665_vm1, %v2664_v2 }
 0x1c0   : > { %v805_v7 = vpop.f32.mrb[0].mxu0 }
 0x1c1   : > { %v3157_v8 = vadd.f32 %v2060_v6, %v805_v7  ;;  %v2139_v9 = vpop.f32.mrb[1].mxu0 }
 0x1c2   : > { %v808_v10 = vpop.f32.mrb[2].mxu0  ;;  %v2349_v9 = vld [vmem:[%s3108_s10] sm:$0xff]  }
 0x1c3   : > { %900 = vrot.lane.b32.xlu1 %v3157_v8, %s2666_s29  ;;  %812 = vrot.lane.b32.xlu0 %v3157_v8, %s2667_s30  ;;  %v2140_v11 = vpop.f32.mrb[3].mxu0 }
 0x1c7   : > { %979 = vrot.lane.b32.xlu1 %v3157_v8, %s2668_s4  ;;  %s3444_s4 = sld [smem:[#allocation23_spill]] }
 0x1cb   : > { %977 = vrot.lane.b32.xlu1 %v3157_v8, %s2669_s27 }
 0x1cd   : > { %p2094_p7 = scmp.ne.s32.totalorder %s3444_s4, 1 }
 0x1cf   : > { %1145 = vrot.lane.b32.xlu1 %v3157_v8, %s2670_s1 }
 0x235   : > { %v901_v12 = vpop.permute.xlu1 %900  ;;  %v813_v13 = vpop.permute.xlu0 %812 }
 0x236   : > { %2142 = vmatpush3.xpose.msk.msra.mxu0 %vm814_vm3, %v813_v13  ;;  %2147 = vmatpush3.msra.mxu1 %v901_v12  ;;  %v2350_v12 = vld [vmem:[%s3108_s10 + $0x8] sm:$0xff]   ;;  %s3438_s10 = scalar_lea.vmem [#allocation7], %s3080_s9 }
 0x237   : > { %2151 = vmatprep.subr.mxu1 %v2664_v2  ;;  %2156 = vmatprep.subr.mxu0 %v2664_v2 }
 0x239   : > { %2144 = vmatmul.mubr.msk.f32.vlgmr.msra.gmra.mrb[4].mxu0 %vm814_vm3, %v3157_v8  ;;  %v980_v22 = vpop.permute.xlu1 %979 }
 0x23a   : > { %2158 = vmatprep.mubr.msk.f32.mxu0 %vm2665_vm1, %v2664_v2 }
 0x23d   : > { %v978_v23 = vpop.permute.xlu1 %977 }
 0x241   : > { %v1146_v24 = vpop.permute.xlu1 %1145 }
 0x30c   : > { %v885_v14 = vpop.f32.mrb[4].mxu0 }
 0x30d   : > { %v2145_v15 = vpop.f32.mrb[5].mxu0  ;;  %v889_v16 = vsel %vm814_vm3, %v885_v14, -inf }
 0x30e   : > { %890 = vmax.xlane.f32.xlu0 %v889_v16 }
 0x324   : > { %1311 = vrot.lane.b32.xlu0 %v3157_v8, %s2671_s13 }
 0x39b   : > { %v891_v17 = vpop.xlane.xlu0 %890 }
 0x39c   : > { %v892_v18 = vsub.f32 %v885_v14, %v891_v17 }
 0x39e   : > { %v893_v19 = vmul.f32 1.442695, %v892_v18 }
 0x39f   : > { %v1312_v29 = vpop.permute.xlu0 %1311 }
 0x3a0   : > { %2357 = vpow2.f32 %v893_v19 }
 0x3aa   : > { %v2358_v20 = vpop.eup %2357 }
 0x3ab   : > { %v895_v21 = vsel %vm814_vm3, %v2358_v20, 0.0 }
 0x3ac   : > { %896 = vadd.xlane.f32.xlu1 %v895_v21 }
 0x3bd   : > { %1143 = vrot.lane.b32.xlu1 %v3157_v8, %s2672_s6 }
 0x3c1   : > { %1309 = vrot.lane.b32.xlu1 %v3157_v8, %s2673_s20 }
 0x439   : > { %v897_v25 = vpop.xlane.xlu1 %896 }
 0x43a   : > { %2359 = vrcp.f32 %v897_v25 }
 0x43d   : > { %v1144_v28 = vpop.permute.xlu1 %1143 }
 0x441   : > { %v1310_v30 = vpop.permute.xlu1 %1309 }
 0x444   : > { %v2360_v26 = vpop.eup %2359 }
 0x445   : > { %v899_v27 = vmul.f32 %v2360_v26, %v2358_v20  ;;  %v2076_v26 = vld [vmem:[%s3438_s10] ss:$0 sm:$0xff] }
 0x447   : > { %2149 = vmatmul.mubr.msk.f32.vlgmr.msra.gmra.mrb[0].mxu1 %vm814_vm3, %v899_v27 }
 0x448   : > { %2152 = vmatpush3.xpose.msk.msra.mxu1 %vm814_vm3, %v980_v22  ;;  %2153 = vmatprep.mubr.msk.f32.mxu1 %vm2665_vm1, %v2664_v2 }
 0x449   : > { %2161 = vmatprep.subr.mxu1 %v2664_v2 }
 0x44b   : > { %2154 = vmatmul.mubr.msk.f32.vlgmr.msra.gmra.mrb[2].mxu1 %vm814_vm3, %v978_v23 }
 0x44c   : > { %2162 = vmatpush3.xpose.msk.msra.mxu1 %vm814_vm3, %v1146_v24  ;;  %2163 = vmatprep.mubr.msk.f32.mxu1 %vm2665_vm1, %v2664_v2 }
 0x44d   : > { %2171 = vmatprep.subr.mxu1 %v2664_v2 }
 0x44f   : > { %2164 = vmatmul.mubr.msk.f32.vlgmr.msra.gmra.mrb[4].mxu1 %vm814_vm3, %v1144_v28 }
 0x450   : > { %2172 = vmatpush3.xpose.msk.msra.mxu1 %vm814_vm3, %v1312_v29  ;;  %2173 = vmatprep.mubr.msk.f32.mxu1 %vm2665_vm1, %v2664_v2 }
 0x451   : > { %2181 = vmatprep.subr.bf16.mxu1 %v2664_v2 }
 0x453   : > { %2174 = vmatmul.mubr.msk.f32.vlgmr.msra.gmra.mrb[6].mxu1 %vm814_vm3, %v1310_v30 }
 0x454   : > { %2185 = vmatprep.mubr.msk.bf16.mxu1 %vm2665_vm1, %v2664_v2  ;;  %2182 = vmatpush3.bf16.msra.mxu1 %v2349_v9 }
 0x455   : > { %2183 = vmatprep.subr.bf16.mxu1 %v2664_v2 }
 0x458   : > { %2184 = vmatpush3.bf16.msra.mxu1 %v2350_v12 }
 0x459   : > { %2197 = vmatprep.subr.bf16.mxu1 %v2664_v2 }
 0x51a   : > { %v972_v31 = vpop.f32.mrb[0].mxu1 }
 0x51b   : > { %976 = vst.msk [vmem:[#allocation3] sm:$0xff] %vm814_vm3, %v972_v31  ;;  %v2150_v32 = vpop.f32.mrb[1].mxu1 }
 0x51e   : > { %v1051_v33 = vpop.f32.mrb[2].mxu1 }
 0x51f   : > { %v2155_v34 = vpop.f32.mrb[3].mxu1  ;;  %v1055_v35 = vsel %vm814_vm3, %v1051_v33, -inf }
 0x520   : > { %1056 = vmax.xlane.f32.xlu1 %v1055_v35 }
 0x522   : > { %v1217_v36 = vpop.f32.mrb[4].mxu1 }
 0x523   : > { %v2165_v37 = vpop.f32.mrb[5].mxu1  ;;  %v1221_v38 = vsel %vm814_vm3, %v1217_v36, -inf }
 0x524   : > { %1222 = vmax.xlane.f32.xlu0 %v1221_v38 }
 0x526   : > { %v1383_v39 = vpop.f32.mrb[6].mxu1 }
 0x527   : > { %v2175_v40 = vpop.f32.mrb[7].mxu1  ;;  %v1387_v41 = vsel %vm814_vm3, %v1383_v39, -inf }
 0x528   : > { %1388 = vmax.xlane.f32.xlu1 %v1387_v41  ;;  %v2352_v40 = vld [vmem:[%s3113_s19 + $0x8] sm:$0xff]  }
 0x529   : > { %v2354_v41 = vld [vmem:[%s3119_s25 + $0x8] sm:$0xff]  }
 0x539   : > { %1066 = vrot.lane.b32.xlu1 %v3157_v8, %s2674_s17 }
 0x5ad   : > { %v1057_v42 = vpop.xlane.xlu1 %1056 }
 0x5ae   : > { %v1058_v43 = vsub.f32 %v1051_v33, %v1057_v42 }
 0x5b0   : > { %v1059_v44 = vmul.f32 1.442695, %v1058_v43 }
 0x5b1   : > { %v1223_v45 = vpop.xlane.xlu0 %1222 }
 0x5b2   : > { %2361 = vpow2.f32 %v1059_v44  ;;  %v1224_v46 = vsub.f32 %v1217_v36, %v1223_v45 }
 0x5b4   : > { %v1225_v47 = vmul.f32 1.442695, %v1224_v46 }
 0x5b5   : > { %v1389_v48 = vpop.xlane.xlu1 %1388 }
 0x5b6   : > { %2363 = vpow2.f32 %v1225_v47  ;;  %v1390_v49 = vsub.f32 %v1383_v39, %v1389_v48  ;;  %v2351_v39 = vld [vmem:[%s3113_s19] sm:$0xff]   ;;  %s3439_s19 = scalar_lea.vmem [#allocation9], %s3080_s9 }
 0x5b7   : > { %v2080_v46 = vld [vmem:[%s3439_s19] ss:$0 sm:$0xff] }
 0x5b8   : > { %v1391_v50 = vmul.f32 1.442695, %v1390_v49  ;;  %v2081_v48 = vld [vmem:[%s3440_s5] ss:$0 sm:$0xff] }
 0x5b9   : > { %v1067_v51 = vpop.permute.xlu1 %1066 }
 0x5ba   : > { %2365 = vpow2.f32 %v1391_v50  ;;  %2157 = vmatpush3.msra.mxu0 %v1067_v51 }
 0x5bb   : > { %2166 = vmatprep.subr.mxu0 %v2664_v2 }
 0x5bc   : > { %v2362_v52 = vpop.eup %2361 }
 0x5bd   : > { %v1061_v53 = vsel %vm814_vm3, %v2362_v52, 0.0 }
 0x5be   : > { %1062 = vadd.xlane.f32.xlu1 %v1061_v53  ;;  %v2356_v53 = vld [vmem:[%s3119_s25 + $0x18] sm:$0xff]  }
 0x5c0   : > { %v2364_v54 = vpop.eup %2363 }
 0x5c1   : > { %v1227_v55 = vsel %vm814_vm3, %v2364_v54, 0.0 }
 0x5c2   : > { %1228 = vadd.xlane.f32.xlu1 %v1227_v55 }
 0x5c4   : > { %v2366_v56 = vpop.eup %2365 }
 0x5c5   : > { %v1393_v57 = vsel %vm814_vm3, %v2366_v56, 0.0 }
 0x5c6   : > { %1394 = vadd.xlane.f32.xlu0 %v1393_v57 }
 0x5d3   : > { %1398 = vrot.lane.b32.xlu1 %v3157_v8, %s2675_s22 }
 0x5dc   : > { %1232 = vrot.lane.b32.xlu0 %v3157_v8, %s2676_s14 }
 0x64b   : > { %v1063_v58 = vpop.xlane.xlu1 %1062 }
 0x64c   : > { %2367 = vrcp.f32 %v1063_v58 }
 0x64f   : > { %v1229_v59 = vpop.xlane.xlu1 %1228 }
 0x650   : > { %2369 = vrcp.f32 %v1229_v59 }
 0x653   : > { %v1395_v60 = vpop.xlane.xlu0 %1394  ;;  %v1399_v3 = vpop.permute.xlu1 %1398 }
 0x654   : > { %2371 = vrcp.f32 %v1395_v60 }
 0x656   : > { %v2368_v61 = vpop.eup %2367 }
 0x657   : > { %v1065_v62 = vmul.f32 %v2368_v61, %v2362_v52  ;;  %v1233_v63 = vpop.permute.xlu0 %1232  ;;  %v2355_v52 = vld [vmem:[%s3119_s25 + $0x10] sm:$0xff]  }
 0x659   : > { %2159 = vmatmul.mubr.msk.f32.vlgmr.msra.gmra.mrb[6].mxu0 %vm814_vm3, %v1065_v62  ;;  %v2086_v62 = vld [vmem:[%s727_s24] ss:$0 sm:$0xff] }
 0x65a   : > { %v2370_v0 = vpop.eup %2369  ;;  %2167 = vmatpush3.msra.mxu0 %v1233_v63  ;;  %2168 = vmatprep.mubr.msk.f32.mxu0 %vm2665_vm1, %v2664_v2 }
 0x65b   : > { %v1231_v1 = vmul.f32 %v2370_v0, %v2364_v54  ;;  %2176 = vmatprep.subr.mxu0 %v2664_v2  ;;  %v2082_v54 = vld [vmem:[%s611_s0] ss:$0 sm:$0xff] }
 0x65d   : > { %2169 = vmatmul.mubr.msk.f32.vlgmr.msra.gmra.mrb[8].mxu0 %vm814_vm3, %v1231_v1 }
 0x65e   : > { %v2372_v5 = vpop.eup %2371  ;;  %2177 = vmatpush3.msra.mxu0 %v1399_v3  ;;  %2178 = vmatprep.mubr.msk.f32.mxu0 %vm2665_vm1, %v2664_v2 }
 0x65f   : > { %v1397_v6 = vmul.f32 %v2372_v5, %v2366_v56  ;;  %2189 = vmatprep.subr.bf16.mxu0 %v2664_v2 }
 0x661   : > { %2179 = vmatmul.mubr.msk.f32.vlgmr.msra.gmra.mrb[10].mxu0 %vm814_vm3, %v1397_v6 }
 0x662   : > { %2193 = vmatprep.mubr.msk.bf16.mxu0 %vm2665_vm1, %v2664_v2  ;;  %2190 = vmatpush3.bf16.msra.mxu0 %v2351_v39 }
 0x663   : > { %2191 = vmatprep.subr.bf16.mxu0 %v2664_v2 }
 0x666   : > { %2192 = vmatpush3.bf16.msra.mxu0 %v2352_v40 }
 0x72c   : > { %v1138_v7 = vpop.f32.mrb[6].mxu0 }
 0x72d   : > { %1142 = vst.msk [vmem:[#allocation3 + $0x8] sm:$0xff] %vm814_vm3, %v1138_v7  ;;  %v2160_v8 = vpop.f32.mrb[7].mxu0 }
 0x730   : > { %v1304_v10 = vpop.f32.mrb[8].mxu0 }
 0x731   : > { %1308 = vst.msk [vmem:[#allocation3 + $0x10] sm:$0xff] %vm814_vm3, %v1304_v10  ;;  %v2170_v11 = vpop.f32.mrb[9].mxu0 }
 0x734   : > { %v1470_v13 = vpop.f32.mrb[10].mxu0 }
 0x735   : > { %1474 = vst.msk [vmem:[#allocation3 + $0x18] sm:$0xff] %vm814_vm3, %v1470_v13  ;;  %v2180_v14 = vpop.f32.mrb[11].mxu0 }
 0x73c   : > { %v1479_v15 = vld [vmem:[#allocation3 + $0x2] ss:$4 sm:$0xff]  ;;  %v1477_v16 = vld [vmem:[#allocation3 + $0x1] ss:$4 sm:$0xff]  ;;  %v1481_v17 = vld [vmem:[#allocation3 + $0x3] ss:$4 sm:$0xff] }
 0x73d   : > { %1487 = vrot.lane.b32.xlu0 %v1479_v15, %s2677_s11  ;;  %1483 = vrot.lane.b32.xlu1 %v1477_v16, %s2678_s3  ;;  %v1475_v19 = vld [vmem:[#allocation3] ss:$4 sm:$0xff] }
 0x73e   : > { %v2092_v16 = vld [vmem:[%s730_s15] ss:$0 sm:$0xff] }
 0x741   : > { %1491 = vrot.lane.b32.xlu1 %v1481_v17, %s2679_s21 }
 0x7af   : > { %v1484_v18 = vpop.permute.xlu1 %1483  ;;  %v1488_v20 = vpop.permute.xlu0 %1487 }
 0x7b0   : > { %v1494_v21 = vsel %vm814_vm3, %v1475_v19, %v1484_v18  ;;  %v2093_v18 = vld [vmem:[%s733_s2] ss:$0 sm:$0xff] }
 0x7b1   : > { %v1496_v23 = vsel %vm1495_vm4, %v1494_v21, %v1488_v20 }
 0x7b3   : > { %v1492_v22 = vpop.permute.xlu1 %1491 }
 0x7b4   : > { %v1498_v24 = vsel %vm1497_vm5, %v1496_v23, %v1492_v22 }
 0x7b5   : > { %v1499_v25 = vpack.c.bf16 %v1498_v24, %v1498_v24 }
 0x7b7   : > { %2186 = vmatmul.mubr.msk.bf16.vlgmr.msra.gmra.mrb[8].mxu1 %vm767_vm2, %v1499_v25 }
 0x7b8   : > { %2205 = vmatprep.mubr.msk.bf16.mxu1 %vm2665_vm1, %v2664_v2 }
 0x88a   : > { %v1560_v27 = vpop.f32.mrb[8].mxu1 }
 0x88b   : > { %v1561_v28 = vadd.f32 %v2076_v26, %v1560_v27  ;;  %v2187_v29 = vpop.f32.mrb[9].mxu1 }
 0x88c   : > { %v1563_v30 = vpop.f32.mrb[10].mxu1 }
 0x88d   : > { %v2188_v31 = vpop.f32.mrb[11].mxu1  ;;  %v1566_v32 = vadd.f32 %v1561_v28, %v3141_v4  ;;  %v2353_v4 = vld [vmem:[%s3119_s25] sm:$0xff]  }
 0x88e   : > { %2198 = vmatpush3.bf16.msra.mxu1 %v2353_v4 }
 0x88f   : > { %v1567_v33 = vsel %vm767_vm2, %v1566_v32, 0.0  ;;  %2199 = vmatprep.subr.bf16.mxu1 %v2664_v2 }
 0x890   : > { %1568 = vadd.xlane.f32.xlu0 %v1567_v33 }
 0x892   : > { %2200 = vmatpush3.bf16.msra.mxu1 %v2354_v41 }
 0x893   : > { %2201 = vmatprep.subr.bf16.mxu1 %v2664_v2 }
 0x896   : > { %2202 = vmatpush3.bf16.msra.mxu1 %v2355_v52 }
 0x897   : > { %2203 = vmatprep.subr.bf16.mxu1 %v2664_v2 }
 0x89a   : > { %2204 = vmatpush3.bf16.msra.mxu1 %v2356_v53 }
 0x91d   : > { %v1569_v34 = vpop.xlane.xlu0 %1568 }
 0x91e   : > { %v1571_v35 = vmul.f32 0.03125, %v1569_v34 }
 0x920   : > { %v1572_v36 = vsub.f32 %v1566_v32, %v1571_v35 }
 0x922   : > { %v1573_v37 = vmul.f32 %v1572_v36, %v1572_v36 }
 0x924   : > { %v1574_v38 = vsel %vm767_vm2, %v1573_v37, 0.0 }
 0x925   : > { %1575 = vadd.xlane.f32.xlu1 %v1574_v38 }
 0x9b2   : > { %v1576_v42 = vpop.xlane.xlu1 %1575 }
 0x9b3   : > { %v1577_v43 = vmul.f32 0.03125, %v1576_v42 }
 0x9b5   : > { %v1579_v44 = vadd.f32 1e-05, %v1577_v43 }
 0x9b7   : > { %2373 = vrsqrt.f32 %v1579_v44 }
 0x9c1   : > { %v2374_v45 = vpop.eup %2373 }
 0x9c2   : > { %v1581_v47 = vmul.f32 %v2374_v45, %v1572_v36 }
 0x9c4   : > { %v1588_v49 = vmul.f32 %v2080_v46, %v1581_v47 }
 0x9c6   : > { %v1596_v50 = vadd.f32 %v2081_v48, %v1588_v49 }
 0x9c8   : > { %v1597_v51 = vpack.c.bf16 %v1596_v50, %v1596_v50 }
 0x9ca   : > { %2194 = vmatmul.mubr.msk.bf16.vlgmr.msra.gmra.mrb[12].mxu0 %vm767_vm2, %v1597_v51 }
 0xa9d   : > { %v1658_v55 = vpop.f32.mrb[12].mxu0 }
 0xa9e   : > { %v1659_v56 = vadd.f32 %v2082_v54, %v1658_v55  ;;  %v2195_v57 = vpop.f32.mrb[13].mxu0 }
 0xa9f   : > { %v1661_v58 = vpop.f32.mrb[14].mxu0 }
 0xaa0   : > { %v1664_v59 = vmax.f32 %v1659_v56, 0.0  ;;  %v2196_v60 = vpop.f32.mrb[15].mxu0 }
 0xaa2   : > { %v1665_v61 = vpack.c.bf16 %v1664_v59, %v1664_v59 }
 0xaa4   : > { %2206 = vmatmul.mubr.msk.bf16.vlgmr.msra.gmra.mrb[12].mxu1 %vm1705_vm6, %v1665_v61 }
 0xb77   : > { %v1743_v63 = vpop.f32.mrb[12].mxu1 }
 0xb78   : > { %v1744_v2 = vadd.f32 %v2086_v62, %v1743_v63  ;;  %v2207_v0 = vpop.f32.mrb[13].mxu1 }
 0xb79   : > { %v1746_v1 = vpop.f32.mrb[14].mxu1 }
 0xb7a   : > { %v2208_v3 = vpop.f32.mrb[15].mxu1  ;;  %v1749_v5 = vadd.f32 %v1744_v2, %v1596_v50 }
 0xb7c   : > { %v1750_v6 = vsel %vm767_vm2, %v1749_v5, 0.0 }
 0xb7d   : > { %1751 = vadd.xlane.f32.xlu0 %v1750_v6 }
 0xc0a   : > { %v1752_v7 = vpop.xlane.xlu0 %1751 }
 0xc0b   : > { %v1753_v8 = vmul.f32 0.03125, %v1752_v7 }
 0xc0d   : > { %v1754_v9 = vsub.f32 %v1749_v5, %v1753_v8 }
 0xc0f   : > { %v1755_v10 = vmul.f32 %v1754_v9, %v1754_v9 }
 0xc11   : > { %v1756_v11 = vsel %vm767_vm2, %v1755_v10, 0.0 }
 0xc12   : > { %1757 = vadd.xlane.f32.xlu0 %v1756_v11 }
 0xc9f   : > { %v1758_v12 = vpop.xlane.xlu0 %1757 }
 0xca0   : > { %v1759_v13 = vmul.f32 0.03125, %v1758_v12 }
 0xca2   : > { %v1761_v14 = vadd.f32 1e-05, %v1759_v13 }
 0xca4   : > { %2375 = vrsqrt.f32 %v1761_v14 }
 0xcae   : > { %v2376_v15 = vpop.eup %2375 }
 0xcaf   : > { %v1763_v17 = vmul.f32 %v2376_v15, %v1754_v9  ;;  %1783 = sbr.rel (%p2094_p7) target bundleno = 3254 (0xcb6), region = 100 }
 0xcb1   : > { %v1770_v19 = vmul.f32 %v2092_v16, %v1763_v17 }
 0xcb3   : > { %v1778_v20 = vadd.f32 %v2093_v18, %v1770_v19 }
 0xcb5   : > { %1779 = vst.msk [vmem:[#allocation2] sm:$0xff] %vm767_vm2, %v1778_v20  ;;  %1784 = vst.msk [vmem:[%s3134_s12] sm:$0xff] (!%p2094_p7), %vm767_vm2, %v1778_v20 }
 0xcb6 PF: > { %s3445_s27 = sld [smem:[#allocation24_spill]]  ;;  %s3446_s7 = sld [smem:[#allocation46_spill]] }
 0xcb7   : > { %s1799_s6 = sshll.u32 %s3134_s12, 4  ;;  %s1786_s20 = scalar_lea.sflag [#allocation6], %s3070_s16  ;;  %s1800_s6 = int_to_ptr.vmem [resolvable:$true] %s1799_s6 }
 0xcb8   : > { %s2527_s17 = scalar_lea.vmem %s1800_s6, 128  ;;  %p3447_p13 = scmp.ne.s32.totalorder %s3412_s23, 0 }
 0xcb9   : > { %p2528_p12 = scmp.ne.s32.totalorder %s1800_s6, %s2527_s17  ;;  %s2680_s22 = smov [#allocation13]  }
 0xcba   : > { %s2531_s14 = sshll.u32 %s2680_s22, 4  ;;  %s2532_s14 = int_to_ptr.vmem [resolvable:$false] %s2531_s14 }
 0xcbb   : > { %p2529_p0 = pnand %p2528_p12, %p3447_p13  ;;  %s2533_s11 = scalar_lea.vmem %s2532_s14, 256 }
 0xcbc   : > { %s2096_s15 = sshll.u32 %s3445_s27, 7  ;;  %p2534_p1 = scmp.lt.s32.totalorder %s1800_s6, %s2532_s14 }
 0xcbd   : > { %s3274_s2 = scalar_lea.hbm %s3446_s7, %s2096_s15  ;;  %p2530_p4 = pneg %p2529_p0 }
 0xcbe   : > { %p2535_p3 = scmp.lt.s32.totalorder %s2533_s11, %s2527_s17 }
 0xcc0   : > { %p2536_p5 = por %p2535_p3, %p2534_p1 }
 0xcc2   : > { %p2537_p10 = pnand %p2536_p5, %p2530_p4 }
 0xcc4   : > { %2540 = shalt.err (!%p2537_p10)
}
 0xcc5   : > { %s2541_s16 = scalar_lea.hbm %s3274_s2, 128  ;;  %s2545_s21 = scalar_lea.hbm %s3446_s7, 256 }
 0xcc6   : > { %p2542_p8 = scmp.ne.s32.totalorder %s3274_s2, %s2541_s16  ;;  %p2546_p2 = scmp.lt.u32.totalorder %s3274_s2, %s3446_s7 }
 0xcc7   : > { %p2547_p6 = scmp.lt.u32.totalorder %s2545_s21, %s2541_s16  ;;  %p2549_p12 = scmp.lt.u32.totalorder %s2541_s16, %s3274_s2 }
 0xcc8   : > { %p2543_p11 = pnand %p2542_p8, %p3447_p13 }
 0xcc9   : > { %p2548_p7 = por %p2547_p6, %p2546_p2 }
 0xcca   : > { %p2544_p9 = pneg %p2543_p11 }
 0xccb   : > { %p2550_p0 = por %p2549_p12, %p2548_p7 }
 0xccd   : > { %p2551_p4 = pnand %p2550_p0, %p2544_p9 }
 0xccf   : > { %2554 = shalt.err (!%p2551_p4)
}
 0xcd0   : > { %2219 = dma.vmem_to_hbm [thread:$0]  (%p3447_p13), %s1800_s6, 128, %s3274_s2, %s1786_s20  }
 0xcd1 PF: > { %s3448_s5 = sld [smem:[#allocation20_spill]]  ;;  %s3449_s8 = sld [smem:[#allocation32_spill]] }
 0xcd2   : > { %p2242_p1 = scmp.ge.s32.totalorder %s2657_s18, 2 }
 0xcd7   : > { %s1811_s26 = sand.u32 1, %s3448_s5   ;;  %p3450_p3 = scmp.ne.s32.totalorder %s3449_s8, 0 }
 0xcd8   : > { %s1812_s28 = scalar_lea.sflag [#allocation6], %s1811_s26 }
 0xcd9   : > { %p2238_p5 = pnand %p2242_p1, %p3450_p3 }
 0xcdb   : > { %2612 = dma.done.wait (!%p2238_p5), %s1812_s28, 128  }
 0xcdc   : > { %2614 = vsyncadd (!%p2238_p5), %s1812_s28, 4294967168  ;;  %s35_s18 = sadd.s32 1, %s2657_s18   ;;  %s3451_s25 = sld [smem:[#allocation18_spill]] }
 0xcdd   : > { %p32_p10 = scmp.ge.s32.totalorder %s35_s18, 6   ;;  %s3452_s26 = sld [smem:[#allocation19_spill]] }
 0xcde   : > { %s3453_s27 = sld [smem:[#allocation28_spill]]  ;;  %s3454_s28 = sld [smem:[#allocation21_spill]] }
 0xcdf   : > { %s3455_s29 = sld [smem:[#allocation22_spill]]  ;;  %s3456_s30 = sld [smem:[#allocation31_spill]] }
 0xce0   : > { %s3457_s14 = sld [smem:[#allocation25_spill]]  ;;  %s3458_s15 = sld [smem:[#allocation26_spill]] }
 0xce1   : > { %s3459_s16 = sld [smem:[#allocation27_spill]]  ;;  %s3460_s17 = sld [smem:[#allocation29_spill]] }
 0xce2   :  { %34 = sbr.rel (!%p32_p10) target bundleno = 28 (0x1c), region = 200 }
 0xce9   :  { %1817 = vsyncpa [#allocation5], 1 }
 0xcea   :  { %1819 = vsyncpa [#allocation5 + $0x1], 1 }
 0xceb   :  { %1820 = vsyncpa [#allocation8], 1 }
 0xcec   :  { %1822 = vsyncpa [#allocation8 + $0x1], 1 }
 0xced   :  { %1823 = vsyncpa [#allocation11], 1 }
 0xcee   :  { %1825 = vsyncpa [#allocation11 + $0x1], 1 }
 0xcef   :  { %1826 = vsyncpa [#allocation6], 1 }
 0xcf0   :  { %1828 = vsyncpa [#allocation6 + $0x1], 1 }

</bundles_post_ra>
